<compile_context>
chip_gen: v5e
topology: v5e:2x2
jax: 0.10.0
libtpu: 0.0.40
codegen_flags: <defaults>
</compile_context>

<pallas_src>
import functools

import jax
import jax.numpy as jnp
from jax import lax
from jax.experimental import pallas as pl
from jax.experimental.pallas import tpu as pltpu


def _round_up(a, m):
    return (a + m - 1) // m * m


def lstm_kernel(x_ref, wih_ref, whh_ref,          # inputs
                out_ref, hn_ref, cn_ref,          # outputs
                xg_scr, h_scr, c_scr,             # VMEM scratch
                *, hidden_size, t_tile, seq_len, time_padded):
    H = hidden_size
    G = 4 * H
    ti = pl.program_id(1)
    b_tile = h_scr.shape[0]
    nfeat = x_ref.shape[-1]

    # init_hidden = zeros (matches EncoderRNN.forward); once per batch tile.
    @pl.when(ti == 0)
    def _init():
        h_scr[...] = jnp.zeros_like(h_scr)
        c_scr[...] = jnp.zeros_like(c_scr)

    # ---- Tile prologue: fused input projection (bias folded via ones column). ----
    # Off the recurrent h/c chain; result parked in VMEM scratch so the unrolled
    # time loop streams one dense (b_tile, 4H) slice per step.
    if nfeat <= 4:
        # input_size is tiny (module default 1): outer-product form on the VPU,
        # avoids a degenerate K=nfeat MXU matmul.
        xg = (x_ref[:, :, 0:1].astype(jnp.float32)
              * wih_ref[0:1, :].astype(jnp.float32))
        for f in range(1, nfeat):
            xg = xg + (x_ref[:, :, f:f + 1].astype(jnp.float32)
                       * wih_ref[f:f + 1, :].astype(jnp.float32))
        xg_scr[...] = xg
    else:
        x_flat = x_ref[...].reshape(t_tile * b_tile, nfeat).astype(jnp.float32)
        xg_scr[...] = jnp.dot(
            x_flat, wih_ref[...].astype(jnp.float32),
            preferred_element_type=jnp.float32).reshape(t_tile, b_tile, G)

    # TODO(synk): hold W_hh in MXU weight registers across the unrolled steps via
    # pltpu.matmul_push_rhs / matmul_acc_lhs / matmul_pop instead of re-streaming
    # the RHS from VMEM each step.
    whh = whh_ref[...]                      # (H, 4H), bf16 by default
    h = h_scr[...]                          # (b_tile, H) f32 state in registers
    c = c_scr[...]

    # Fully unrolled time loop (t_tile is small & static): one MXU op + gate math
    # per step on the serial dependency chain.
    for t in range(t_tile):
        gates = xg_scr[t] + jnp.dot(h.astype(whh.dtype), whh,
                                    preferred_element_type=jnp.float32)
        # Gate order permuted in the wrapper to [i | f | o | g]: one fused sigmoid
        # (tanh form -> single EUP pass) over the first 3H lanes.
        sig = jnp.tanh(0.5 * gates[:, :3 * H]) * 0.5 + 0.5
        i_g = sig[:, 0 * H:1 * H]
        f_g = sig[:, 1 * H:2 * H]
        o_g = sig[:, 2 * H:3 * H]
        g_g = jnp.tanh(gates[:, 3 * H:4 * H])
        c_new = f_g * c + i_g * g_g
        h_new = o_g * jnp.tanh(c_new)
        if time_padded:
            valid = (ti * t_tile + t) < seq_len     # padded steps don't touch state
            c = jnp.where(valid, c_new, c)
            h = jnp.where(valid, h_new, h)
        else:
            c, h = c_new, h_new
        # TODO(synk): for b_tile >= 64, buffer 8 steps and store dense (b,8,H)
        # slabs instead of per-step 1-sublane masked stores.
        out_ref[:, t:t + 1, :] = h[:, None, :].astype(out_ref.dtype)

    # Persist state for the next T tile; also write the running h_n/c_n every tile
    # so correctness never depends on writeback timing of the constant-index block.
    h_scr[...] = h
    c_scr[...] = c
    hn_ref[...] = h.astype(hn_ref.dtype)
    cn_ref[...] = c.astype(cn_ref.dtype)


def encoder_rnn_forward(x, w_ih, w_hh, b_ih, b_hh, *,
                        max_t_tile=16, max_b_tile=128,
                        recurrent_dtype=jnp.bfloat16):
    """x: (B, T, I) batch-first.  Weights in PyTorch nn.LSTM layout:
       w_ih: (4H, I), w_hh: (4H, H), b_ih/b_hh: (4H,).
       Returns (output (B, T, H), (h_n (1, B, H), c_n (1, B, H)))."""
    B, T, I = x.shape
    H = w_hh.shape[1]
    G = 4 * H

    # Gate permutation [i|f|g|o] -> [i|f|o|g]: lets the kernel run one fused
    # sigmoid over the first 3H lanes.
    def permute_gates(w):
        return jnp.concatenate(
            [w[0:H], w[H:2 * H], w[3 * H:4 * H], w[2 * H:3 * H]], axis=0)

    w_ih_p = permute_gates(w_ih.astype(jnp.float32))            # (4H, I)
    w_hh_p = permute_gates(w_hh.astype(jnp.float32))            # (4H, H)
    bias_p = permute_gates((b_ih + b_hh).astype(jnp.float32))   # (4H,)

    # Bias folded into the input projection via an appended ones column.
    wih_aug = jnp.concatenate([jnp.transpose(w_ih_p), bias_p[None, :]], axis=0)  # (I+1, 4H)
    # Recurrent weights in bf16 -> single-pass MXU on the serial critical path
    # (h/c state and gate math stay f32 in-kernel).
    whh_t = jnp.transpose(w_hh_p).astype(recurrent_dtype)                        # (H, 4H)

    # Tiling: pad batch to a sublane multiple and feed many rows per step (MXU M
    # is ~free since the T chain is serial); pad T to a multiple of t_tile.
    # TODO(synk): on v7x pass max_b_tile=round_up(B//2, 8) so n_b >= 2 and the
    # "parallel" batch axis actually splits across both TensorCores; re-derive the
    # VMEM budget (set vmem_limit_bytes) when scaling b_tile/t_tile up.
    max_b_tile = _round_up(max(max_b_tile, 8), 8)
    max_t_tile = _round_up(max(max_t_tile, 8), 8)
    b_tile = min(_round_up(B, 8), max_b_tile)
    B_pad = _round_up(B, b_tile)
    t_tile = min(_round_up(T, 8), max_t_tile)
    T_pad = _round_up(T, t_tile)
    n_b = B_pad // b_tile
    n_t = T_pad // t_tile

    # x stays tiny (I+1 features); time-major x gives the kernel dense per-step
    # slices.  The big output stays batch-first (no wrapper output transpose).
    x_aug = jnp.concatenate(
        [x.astype(jnp.float32), jnp.ones((B, T, 1), jnp.float32)], axis=-1)
    x_aug = jnp.transpose(x_aug, (1, 0, 2))                     # (T, B, I+1)
    x_aug = jnp.pad(x_aug, ((0, T_pad - T), (0, B_pad - B), (0, 0)))

    kernel = functools.partial(
        lstm_kernel, hidden_size=H, t_tile=t_tile, seq_len=T,
        time_padded=(T_pad != T))

    grid_spec = pltpu.PrefetchScalarGridSpec(
        num_scalar_prefetch=0,
        grid=(n_b, n_t),
        in_specs=[
            pl.BlockSpec((t_tile, b_tile, I + 1), lambda bi, ti: (ti, bi, 0)),
            # TODO(synk): mark the two invariant weight blocks with
            # pipeline_mode=pl.Buffered(1) to drop their pointless second buffer.
            pl.BlockSpec((I + 1, G), lambda bi, ti: (0, 0)),
            pl.BlockSpec((H, G), lambda bi, ti: (0, 0)),
        ],
        out_specs=[
            pl.BlockSpec((b_tile, t_tile, H), lambda bi, ti: (bi, ti, 0)),
            pl.BlockSpec((b_tile, H), lambda bi, ti: (bi, 0)),
            pl.BlockSpec((b_tile, H), lambda bi, ti: (bi, 0)),
        ],
        scratch_shapes=[
            pltpu.VMEM((t_tile, b_tile, G), jnp.float32),   # per-tile x@W_ih + b
            pltpu.VMEM((b_tile, H), jnp.float32),           # h state
            pltpu.VMEM((b_tile, H), jnp.float32),           # c state
        ],
    )

    out_pad, hn_pad, cn_pad = pl.pallas_call(
        kernel,
        out_shape=(
            jax.ShapeDtypeStruct((B_pad, T_pad, H), jnp.float32),
            jax.ShapeDtypeStruct((B_pad, H), jnp.float32),
            jax.ShapeDtypeStruct((B_pad, H), jnp.float32),
        ),
        grid_spec=grid_spec,
        compiler_params=pltpu.CompilerParams(
            # Batch tiles are independent recurrences; the time axis carries
            # state so it must stay "arbitrary".
            dimension_semantics=("parallel", "arbitrary")),
    )(x_aug, wih_aug, whh_t)

    out = out_pad[:B, :T, :]
    hidden = (hn_pad[:B][None, :, :], cn_pad[:B][None, :, :])   # (1, B, H)
    return out, hidden


def encoder_rnn_reference(x, w_ih, w_hh, b_ih, b_hh):
    """Pure-JAX lax.scan LSTM reference (PyTorch semantics) for verification."""
    B, T, I = x.shape
    H = w_hh.shape[1]
    wih_t = jnp.transpose(w_ih)
    whh_t = jnp.transpose(w_hh)
    b = b_ih + b_hh

    def step(carry, x_t):
        h, c = carry
        gates = x_t @ wih_t + h @ whh_t + b
        i_g = jax.nn.sigmoid(gates[:, 0 * H:1 * H])
        f_g = jax.nn.sigmoid(gates[:, 1 * H:2 * H])
        g_g = jnp.tanh(gates[:, 2 * H:3 * H])
        o_g = jax.nn.sigmoid(gates[:, 3 * H:4 * H])
        c_new = f_g * c + i_g * g_g
        h_new = o_g * jnp.tanh(c_new)
        return (h_new, c_new), h_new

    h0 = jnp.zeros((B, H), jnp.float32)
    c0 = jnp.zeros((B, H), jnp.float32)
    (h_n, c_n), ys = lax.scan(step, (h0, c0), jnp.transpose(x, (1, 0, 2)))
    return jnp.transpose(ys, (1, 0, 2)), (h_n[None], c_n[None])


if __name__ == "__main__":
    # Module defaults: input_size=1, hidden_size=128, nlayers=1, unidirectional.
    # TODO(synk): multi-layer / bidirectional variants not implemented (defaults only).
    B, T, I, H = 2, 8, 1, 128

    key = jax.random.PRNGKey(0)
    k1, k2, k3, k4, kx = jax.random.split(key, 5)
    bound = 1.0 / jnp.sqrt(H)   # PyTorch nn.LSTM default uniform init range
    w_ih = jax.random.uniform(k1, (4 * H, I), jnp.float32, -bound, bound)
    w_hh = jax.random.uniform(k2, (4 * H, H), jnp.float32, -bound, bound)
    b_ih = jax.random.uniform(k3, (4 * H,), jnp.float32, -bound, bound)
    b_hh = jax.random.uniform(k4, (4 * H,), jnp.float32, -bound, bound)
    x = jax.random.normal(kx, (B, T, I), jnp.float32)

    out, (h_n, c_n) = encoder_rnn_forward(x, w_ih, w_hh, b_ih, b_hh)
    jax.block_until_ready((out, h_n, c_n))

    out_ref, (h_ref, c_ref) = encoder_rnn_reference(x, w_ih, w_hh, b_ih, b_hh)
    assert out.shape == (B, T, H)
    assert h_n.shape == (1, B, H) and c_n.shape == (1, B, H)
    # bf16 recurrent matmul + tanh-form sigmoid => relaxed tolerance vs f32 scan ref.
    assert jnp.allclose(out, out_ref, atol=2e-2, rtol=2e-2)
    assert jnp.allclose(h_n, h_ref, atol=2e-2, rtol=2e-2)
    assert jnp.allclose(c_n, c_ref, atol=2e-2, rtol=2e-2)

    print("KERNEL_OK")
</pallas_src>

<mosaic_0001>
module attributes {stable_mosaic.version = 11 : i64} {
  func.func @lstm_kernel(%arg0: i32, %arg1: i32, %arg2: memref<8x8x2xf32, #tpu.memory_space<vmem>>, %arg3: memref<2x512xf32, #tpu.memory_space<vmem>>, %arg4: memref<128x512xbf16, #tpu.memory_space<vmem>>, %arg5: memref<8x8x128xf32, #tpu.memory_space<vmem>>, %arg6: memref<8x128xf32, #tpu.memory_space<vmem>>, %arg7: memref<8x128xf32, #tpu.memory_space<vmem>>, %arg8: memref<8x8x512xf32, #tpu.memory_space<vmem>>, %arg9: memref<8x128xf32, #tpu.memory_space<vmem>>, %arg10: memref<8x128xf32, #tpu.memory_space<vmem>>) attributes {dimension_semantics = [#tpu.dimension_semantics<parallel>, #tpu.dimension_semantics<arbitrary>], iteration_bounds = array<i64: 1, 1>, scalar_prefetch = 0 : i64, scratch_operands = 3 : i64, tpu.core_type = #tpu.core_type<tc>, window_params = [{transform_indices = @transform_0, window_bounds = array<i64: 8, 8, 2>}, {pipeline_mode = #tpu.pipeline_mode<synchronous>, transform_indices = @transform_1, window_bounds = array<i64: 2, 512>}, {pipeline_mode = #tpu.pipeline_mode<synchronous>, transform_indices = @transform_2, window_bounds = array<i64: 128, 512>}, {transform_indices = @transform_3, window_bounds = array<i64: 8, 8, 128>}, {transform_indices = @transform_4, window_bounds = array<i64: 8, 128>}, {transform_indices = @transform_5, window_bounds = array<i64: 8, 128>}]} {
    %c0_i32 = arith.constant 0 : i32
    %0 = arith.cmpi eq, %arg1, %c0_i32 : i32
    %1 = arith.extui %0 : i1 to i32
    %c0_i32_0 = arith.constant 0 : i32
    %2 = arith.cmpi ne, %1, %c0_i32_0 : i32
    scf.if %2 {
      %cst_99 = arith.constant 0.000000e+00 : f32
      %224 = vector.broadcast %cst_99 : f32 to vector<8x128xf32>
      %c0_100 = arith.constant 0 : index
      %c0_101 = arith.constant 0 : index
      %225 = vector.load %arg9[%c0_100, %c0_101] : memref<8x128xf32, #tpu.memory_space<vmem>>, vector<8x128xf32>
      tpu.vector_store %arg9[%c0_100, %c0_101], %224 {strides = array<i32>} : memref<8x128xf32, #tpu.memory_space<vmem>>, vector<8x128xf32>,
      %cst_102 = arith.constant 0.000000e+00 : f32
      %226 = vector.broadcast %cst_102 : f32 to vector<8x128xf32>
      %c0_103 = arith.constant 0 : index
      %c0_104 = arith.constant 0 : index
      %227 = vector.load %arg10[%c0_103, %c0_104] : memref<8x128xf32, #tpu.memory_space<vmem>>, vector<8x128xf32>
      tpu.vector_store %arg10[%c0_103, %c0_104], %226 {strides = array<i32>} : memref<8x128xf32, #tpu.memory_space<vmem>>, vector<8x128xf32>,
    } else {
    }
    %c0 = arith.constant 0 : index
    %c0_1 = arith.constant 0 : index
    %c0_2 = arith.constant 0 : index
    %3 = vector.load %arg2[%c0, %c0_1, %c0_2] : memref<8x8x2xf32, #tpu.memory_space<vmem>>, vector<8x8x1xf32>
    %c0_3 = arith.constant 0 : index
    %c0_4 = arith.constant 0 : index
    %4 = vector.load %arg3[%c0_3, %c0_4] : memref<2x512xf32, #tpu.memory_space<vmem>>, vector<1x512xf32>
    %5 = vector.shape_cast %4 : vector<1x512xf32> to vector<1x1x512xf32>
    %6 = vector.broadcast %3 : vector<8x8x1xf32> to vector<8x8x512xf32>
    %7 = vector.broadcast %5 : vector<1x1x512xf32> to vector<8x8x512xf32>
    %8 = arith.mulf %6, %7 : vector<8x8x512xf32>
    %c0_5 = arith.constant 0 : index
    %c0_6 = arith.constant 0 : index
    %c1 = arith.constant 1 : index
    %9 = vector.load %arg2[%c0_5, %c0_6, %c1] : memref<8x8x2xf32, #tpu.memory_space<vmem>>, vector<8x8x1xf32>
    %c1_7 = arith.constant 1 : index
    %c0_8 = arith.constant 0 : index
    %10 = vector.load %arg3[%c1_7, %c0_8] : memref<2x512xf32, #tpu.memory_space<vmem>>, vector<1x512xf32>
    %11 = vector.shape_cast %10 : vector<1x512xf32> to vector<1x1x512xf32>
    %12 = vector.broadcast %9 : vector<8x8x1xf32> to vector<8x8x512xf32>
    %13 = vector.broadcast %11 : vector<1x1x512xf32> to vector<8x8x512xf32>
    %14 = arith.mulf %12, %13 : vector<8x8x512xf32>
    %15 = arith.addf %8, %14 : vector<8x8x512xf32>
    %c0_9 = arith.constant 0 : index
    %c0_10 = arith.constant 0 : index
    %c0_11 = arith.constant 0 : index
    %16 = vector.load %arg8[%c0_9, %c0_10, %c0_11] : memref<8x8x512xf32, #tpu.memory_space<vmem>>, vector<8x8x512xf32>
    tpu.vector_store %arg8[%c0_9, %c0_10, %c0_11], %15 {strides = array<i32>} : memref<8x8x512xf32, #tpu.memory_space<vmem>>, vector<8x8x512xf32>,
    %c0_12 = arith.constant 0 : index
    %c0_13 = arith.constant 0 : index
    %17 = vector.load %arg4[%c0_12, %c0_13] : memref<128x512xbf16, #tpu.memory_space<vmem>>, vector<128x512xbf16>
    %c0_14 = arith.constant 0 : index
    %c0_15 = arith.constant 0 : index
    %18 = vector.load %arg9[%c0_14, %c0_15] : memref<8x128xf32, #tpu.memory_space<vmem>>, vector<8x128xf32>
    %c0_16 = arith.constant 0 : index
    %c0_17 = arith.constant 0 : index
    %19 = vector.load %arg10[%c0_16, %c0_17] : memref<8x128xf32, #tpu.memory_space<vmem>>, vector<8x128xf32>
    %c0_18 = arith.constant 0 : index
    %c0_19 = arith.constant 0 : index
    %c0_20 = arith.constant 0 : index
    %20 = vector.load %arg8[%c0_18, %c0_19, %c0_20] : memref<8x8x512xf32, #tpu.memory_space<vmem>>, vector<1x8x512xf32>
    %21 = vector.shape_cast %20 : vector<1x8x512xf32> to vector<8x512xf32>
    %22 = arith.truncf %18 : vector<8x128xf32> to vector<8x128xbf16>
    %cst = arith.constant dense<0.000000e+00> : vector<8x512xf32>
    %23 = tpu.matmul %22, %17, %cst {dimension_numbers = #tpu.dot_dimension_numbers<[1], [0], [0], [1], [0, 0, 1, 1], [], []>} : vector<8x128xbf16>, vector<128x512xbf16>, vector<8x512xf32> -> vector<8x512xf32>
    %24 = arith.addf %21, %23 : vector<8x512xf32>
    %25 = vector.extract_strided_slice %24 {offsets = [0, 0], sizes = [8, 384], strides = [1, 1]} : vector<8x512xf32> to vector<8x384xf32>
    %cst_21 = arith.constant 5.000000e-01 : f32
    %26 = vector.broadcast %cst_21 : f32 to vector<8x384xf32>
    %27 = arith.mulf %26, %25 : vector<8x384xf32>
    %28 = math.tanh %27 : vector<8x384xf32>
    %cst_22 = arith.constant 5.000000e-01 : f32
    %29 = vector.broadcast %cst_22 : f32 to vector<8x384xf32>
    %30 = arith.mulf %28, %29 : vector<8x384xf32>
    %cst_23 = arith.constant 5.000000e-01 : f32
    %31 = vector.broadcast %cst_23 : f32 to vector<8x384xf32>
    %32 = arith.addf %30, %31 : vector<8x384xf32>
    %33 = vector.extract_strided_slice %32 {offsets = [0, 0], sizes = [8, 128], strides = [1, 1]} : vector<8x384xf32> to vector<8x128xf32>
    %34 = vector.extract_strided_slice %32 {offsets = [0, 128], sizes = [8, 128], strides = [1, 1]} : vector<8x384xf32> to vector<8x128xf32>
    %35 = vector.extract_strided_slice %32 {offsets = [0, 256], sizes = [8, 128], strides = [1, 1]} : vector<8x384xf32> to vector<8x128xf32>
    %36 = vector.extract_strided_slice %24 {offsets = [0, 384], sizes = [8, 128], strides = [1, 1]} : vector<8x512xf32> to vector<8x128xf32>
    %37 = math.tanh %36 : vector<8x128xf32>
    %38 = arith.mulf %34, %19 : vector<8x128xf32>
    %39 = arith.mulf %33, %37 : vector<8x128xf32>
    %40 = arith.addf %38, %39 : vector<8x128xf32>
    %41 = math.tanh %40 : vector<8x128xf32>
    %42 = arith.mulf %35, %41 : vector<8x128xf32>
    %43 = vector.shape_cast %42 : vector<8x128xf32> to vector<8x1x128xf32>
    %c0_24 = arith.constant 0 : index
    %c0_25 = arith.constant 0 : index
    %c0_26 = arith.constant 0 : index
    %44 = vector.load %arg5[%c0_24, %c0_25, %c0_26] : memref<8x8x128xf32, #tpu.memory_space<vmem>>, vector<8x1x128xf32>
    tpu.vector_store %arg5[%c0_24, %c0_25, %c0_26], %43 {strides = array<i32>} : memref<8x8x128xf32, #tpu.memory_space<vmem>>, vector<8x1x128xf32>,
    %c1_27 = arith.constant 1 : index
    %c0_28 = arith.constant 0 : index
    %c0_29 = arith.constant 0 : index
    %45 = vector.load %arg8[%c1_27, %c0_28, %c0_29] : memref<8x8x512xf32, #tpu.memory_space<vmem>>, vector<1x8x512xf32>
    %46 = vector.shape_cast %45 : vector<1x8x512xf32> to vector<8x512xf32>
    %47 = arith.truncf %42 : vector<8x128xf32> to vector<8x128xbf16>
    %cst_30 = arith.constant dense<0.000000e+00> : vector<8x512xf32>
    %48 = tpu.matmul %47, %17, %cst_30 {dimension_numbers = #tpu.dot_dimension_numbers<[1], [0], [0], [1], [0, 0, 1, 1], [], []>} : vector<8x128xbf16>, vector<128x512xbf16>, vector<8x512xf32> -> vector<8x512xf32>
    %49 = arith.addf %46, %48 : vector<8x512xf32>
    %50 = vector.extract_strided_slice %49 {offsets = [0, 0], sizes = [8, 384], strides = [1, 1]} : vector<8x512xf32> to vector<8x384xf32>
    %cst_31 = arith.constant 5.000000e-01 : f32
    %51 = vector.broadcast %cst_31 : f32 to vector<8x384xf32>
    %52 = arith.mulf %51, %50 : vector<8x384xf32>
    %53 = math.tanh %52 : vector<8x384xf32>
    %cst_32 = arith.constant 5.000000e-01 : f32
    %54 = vector.broadcast %cst_32 : f32 to vector<8x384xf32>
    %55 = arith.mulf %53, %54 : vector<8x384xf32>
    %cst_33 = arith.constant 5.000000e-01 : f32
    %56 = vector.broadcast %cst_33 : f32 to vector<8x384xf32>
    %57 = arith.addf %55, %56 : vector<8x384xf32>
    %58 = vector.extract_strided_slice %57 {offsets = [0, 0], sizes = [8, 128], strides = [1, 1]} : vector<8x384xf32> to vector<8x128xf32>
    %59 = vector.extract_strided_slice %57 {offsets = [0, 128], sizes = [8, 128], strides = [1, 1]} : vector<8x384xf32> to vector<8x128xf32>
    %60 = vector.extract_strided_slice %57 {offsets = [0, 256], sizes = [8, 128], strides = [1, 1]} : vector<8x384xf32> to vector<8x128xf32>
    %61 = vector.extract_strided_slice %49 {offsets = [0, 384], sizes = [8, 128], strides = [1, 1]} : vector<8x512xf32> to vector<8x128xf32>
    %62 = math.tanh %61 : vector<8x128xf32>
    %63 = arith.mulf %59, %40 : vector<8x128xf32>
    %64 = arith.mulf %58, %62 : vector<8x128xf32>
    %65 = arith.addf %63, %64 : vector<8x128xf32>
    %66 = math.tanh %65 : vector<8x128xf32>
    %67 = arith.mulf %60, %66 : vector<8x128xf32>
    %68 = vector.shape_cast %67 : vector<8x128xf32> to vector<8x1x128xf32>
    %c0_34 = arith.constant 0 : index
    %c1_35 = arith.constant 1 : index
    %c0_36 = arith.constant 0 : index
    %69 = vector.load %arg5[%c0_34, %c1_35, %c0_36] : memref<8x8x128xf32, #tpu.memory_space<vmem>>, vector<8x1x128xf32>
    tpu.vector_store %arg5[%c0_34, %c1_35, %c0_36], %68 {strides = array<i32>} : memref<8x8x128xf32, #tpu.memory_space<vmem>>, vector<8x1x128xf32>,
    %c2 = arith.constant 2 : index
    %c0_37 = arith.constant 0 : index
    %c0_38 = arith.constant 0 : index
    %70 = vector.load %arg8[%c2, %c0_37, %c0_38] : memref<8x8x512xf32, #tpu.memory_space<vmem>>, vector<1x8x512xf32>
    %71 = vector.shape_cast %70 : vector<1x8x512xf32> to vector<8x512xf32>
    %72 = arith.truncf %67 : vector<8x128xf32> to vector<8x128xbf16>
    %cst_39 = arith.constant dense<0.000000e+00> : vector<8x512xf32>
    %73 = tpu.matmul %72, %17, %cst_39 {dimension_numbers = #tpu.dot_dimension_numbers<[1], [0], [0], [1], [0, 0, 1, 1], [], []>} : vector<8x128xbf16>, vector<128x512xbf16>, vector<8x512xf32> -> vector<8x512xf32>
    %74 = arith.addf %71, %73 : vector<8x512xf32>
    %75 = vector.extract_strided_slice %74 {offsets = [0, 0], sizes = [8, 384], strides = [1, 1]} : vector<8x512xf32> to vector<8x384xf32>
    %cst_40 = arith.constant 5.000000e-01 : f32
    %76 = vector.broadcast %cst_40 : f32 to vector<8x384xf32>
    %77 = arith.mulf %76, %75 : vector<8x384xf32>
    %78 = math.tanh %77 : vector<8x384xf32>
    %cst_41 = arith.constant 5.000000e-01 : f32
    %79 = vector.broadcast %cst_41 : f32 to vector<8x384xf32>
    %80 = arith.mulf %78, %79 : vector<8x384xf32>
    %cst_42 = arith.constant 5.000000e-01 : f32
    %81 = vector.broadcast %cst_42 : f32 to vector<8x384xf32>
    %82 = arith.addf %80, %81 : vector<8x384xf32>
    %83 = vector.extract_strided_slice %82 {offsets = [0, 0], sizes = [8, 128], strides = [1, 1]} : vector<8x384xf32> to vector<8x128xf32>
    %84 = vector.extract_strided_slice %82 {offsets = [0, 128], sizes = [8, 128], strides = [1, 1]} : vector<8x384xf32> to vector<8x128xf32>
    %85 = vector.extract_strided_slice %82 {offsets = [0, 256], sizes = [8, 128], strides = [1, 1]} : vector<8x384xf32> to vector<8x128xf32>
    %86 = vector.extract_strided_slice %74 {offsets = [0, 384], sizes = [8, 128], strides = [1, 1]} : vector<8x512xf32> to vector<8x128xf32>
    %87 = math.tanh %86 : vector<8x128xf32>
    %88 = arith.mulf %84, %65 : vector<8x128xf32>
    %89 = arith.mulf %83, %87 : vector<8x128xf32>
    %90 = arith.addf %88, %89 : vector<8x128xf32>
    %91 = math.tanh %90 : vector<8x128xf32>
    %92 = arith.mulf %85, %91 : vector<8x128xf32>
    %93 = vector.shape_cast %92 : vector<8x128xf32> to vector<8x1x128xf32>
    %c0_43 = arith.constant 0 : index
    %c2_44 = arith.constant 2 : index
    %c0_45 = arith.constant 0 : index
    %94 = vector.load %arg5[%c0_43, %c2_44, %c0_45] : memref<8x8x128xf32, #tpu.memory_space<vmem>>, vector<8x1x128xf32>
    tpu.vector_store %arg5[%c0_43, %c2_44, %c0_45], %93 {strides = array<i32>} : memref<8x8x128xf32, #tpu.memory_space<vmem>>, vector<8x1x128xf32>,
    %c3 = arith.constant 3 : index
    %c0_46 = arith.constant 0 : index
    %c0_47 = arith.constant 0 : index
    %95 = vector.load %arg8[%c3, %c0_46, %c0_47] : memref<8x8x512xf32, #tpu.memory_space<vmem>>, vector<1x8x512xf32>
    %96 = vector.shape_cast %95 : vector<1x8x512xf32> to vector<8x512xf32>
    %97 = arith.truncf %92 : vector<8x128xf32> to vector<8x128xbf16>
    %cst_48 = arith.constant dense<0.000000e+00> : vector<8x512xf32>
    %98 = tpu.matmul %97, %17, %cst_48 {dimension_numbers = #tpu.dot_dimension_numbers<[1], [0], [0], [1], [0, 0, 1, 1], [], []>} : vector<8x128xbf16>, vector<128x512xbf16>, vector<8x512xf32> -> vector<8x512xf32>
    %99 = arith.addf %96, %98 : vector<8x512xf32>
    %100 = vector.extract_strided_slice %99 {offsets = [0, 0], sizes = [8, 384], strides = [1, 1]} : vector<8x512xf32> to vector<8x384xf32>
    %cst_49 = arith.constant 5.000000e-01 : f32
    %101 = vector.broadcast %cst_49 : f32 to vector<8x384xf32>
    %102 = arith.mulf %101, %100 : vector<8x384xf32>
    %103 = math.tanh %102 : vector<8x384xf32>
    %cst_50 = arith.constant 5.000000e-01 : f32
    %104 = vector.broadcast %cst_50 : f32 to vector<8x384xf32>
    %105 = arith.mulf %103, %104 : vector<8x384xf32>
    %cst_51 = arith.constant 5.000000e-01 : f32
    %106 = vector.broadcast %cst_51 : f32 to vector<8x384xf32>
    %107 = arith.addf %105, %106 : vector<8x384xf32>
    %108 = vector.extract_strided_slice %107 {offsets = [0, 0], sizes = [8, 128], strides = [1, 1]} : vector<8x384xf32> to vector<8x128xf32>
    %109 = vector.extract_strided_slice %107 {offsets = [0, 128], sizes = [8, 128], strides = [1, 1]} : vector<8x384xf32> to vector<8x128xf32>
    %110 = vector.extract_strided_slice %107 {offsets = [0, 256], sizes = [8, 128], strides = [1, 1]} : vector<8x384xf32> to vector<8x128xf32>
    %111 = vector.extract_strided_slice %99 {offsets = [0, 384], sizes = [8, 128], strides = [1, 1]} : vector<8x512xf32> to vector<8x128xf32>
    %112 = math.tanh %111 : vector<8x128xf32>
    %113 = arith.mulf %109, %90 : vector<8x128xf32>
    %114 = arith.mulf %108, %112 : vector<8x128xf32>
    %115 = arith.addf %113, %114 : vector<8x128xf32>
    %116 = math.tanh %115 : vector<8x128xf32>
    %117 = arith.mulf %110, %116 : vector<8x128xf32>
    %118 = vector.shape_cast %117 : vector<8x128xf32> to vector<8x1x128xf32>
    %c0_52 = arith.constant 0 : index
    %c3_53 = arith.constant 3 : index
    %c0_54 = arith.constant 0 : index
    %119 = vector.load %arg5[%c0_52, %c3_53, %c0_54] : memref<8x8x128xf32, #tpu.memory_space<vmem>>, vector<8x1x128xf32>
    tpu.vector_store %arg5[%c0_52, %c3_53, %c0_54], %118 {strides = array<i32>} : memref<8x8x128xf32, #tpu.memory_space<vmem>>, vector<8x1x128xf32>,
    %c4 = arith.constant 4 : index
    %c0_55 = arith.constant 0 : index
    %c0_56 = arith.constant 0 : index
    %120 = vector.load %arg8[%c4, %c0_55, %c0_56] : memref<8x8x512xf32, #tpu.memory_space<vmem>>, vector<1x8x512xf32>
    %121 = vector.shape_cast %120 : vector<1x8x512xf32> to vector<8x512xf32>
    %122 = arith.truncf %117 : vector<8x128xf32> to vector<8x128xbf16>
    %cst_57 = arith.constant dense<0.000000e+00> : vector<8x512xf32>
    %123 = tpu.matmul %122, %17, %cst_57 {dimension_numbers = #tpu.dot_dimension_numbers<[1], [0], [0], [1], [0, 0, 1, 1], [], []>} : vector<8x128xbf16>, vector<128x512xbf16>, vector<8x512xf32> -> vector<8x512xf32>
    %124 = arith.addf %121, %123 : vector<8x512xf32>
    %125 = vector.extract_strided_slice %124 {offsets = [0, 0], sizes = [8, 384], strides = [1, 1]} : vector<8x512xf32> to vector<8x384xf32>
    %cst_58 = arith.constant 5.000000e-01 : f32
    %126 = vector.broadcast %cst_58 : f32 to vector<8x384xf32>
    %127 = arith.mulf %126, %125 : vector<8x384xf32>
    %128 = math.tanh %127 : vector<8x384xf32>
    %cst_59 = arith.constant 5.000000e-01 : f32
    %129 = vector.broadcast %cst_59 : f32 to vector<8x384xf32>
    %130 = arith.mulf %128, %129 : vector<8x384xf32>
    %cst_60 = arith.constant 5.000000e-01 : f32
    %131 = vector.broadcast %cst_60 : f32 to vector<8x384xf32>
    %132 = arith.addf %130, %131 : vector<8x384xf32>
    %133 = vector.extract_strided_slice %132 {offsets = [0, 0], sizes = [8, 128], strides = [1, 1]} : vector<8x384xf32> to vector<8x128xf32>
    %134 = vector.extract_strided_slice %132 {offsets = [0, 128], sizes = [8, 128], strides = [1, 1]} : vector<8x384xf32> to vector<8x128xf32>
    %135 = vector.extract_strided_slice %132 {offsets = [0, 256], sizes = [8, 128], strides = [1, 1]} : vector<8x384xf32> to vector<8x128xf32>
    %136 = vector.extract_strided_slice %124 {offsets = [0, 384], sizes = [8, 128], strides = [1, 1]} : vector<8x512xf32> to vector<8x128xf32>
    %137 = math.tanh %136 : vector<8x128xf32>
    %138 = arith.mulf %134, %115 : vector<8x128xf32>
    %139 = arith.mulf %133, %137 : vector<8x128xf32>
    %140 = arith.addf %138, %139 : vector<8x128xf32>
    %141 = math.tanh %140 : vector<8x128xf32>
    %142 = arith.mulf %135, %141 : vector<8x128xf32>
    %143 = vector.shape_cast %142 : vector<8x128xf32> to vector<8x1x128xf32>
    %c0_61 = arith.constant 0 : index
    %c4_62 = arith.constant 4 : index
    %c0_63 = arith.constant 0 : index
    %144 = vector.load %arg5[%c0_61, %c4_62, %c0_63] : memref<8x8x128xf32, #tpu.memory_space<vmem>>, vector<8x1x128xf32>
    tpu.vector_store %arg5[%c0_61, %c4_62, %c0_63], %143 {strides = array<i32>} : memref<8x8x128xf32, #tpu.memory_space<vmem>>, vector<8x1x128xf32>,
    %c5 = arith.constant 5 : index
    %c0_64 = arith.constant 0 : index
    %c0_65 = arith.constant 0 : index
    %145 = vector.load %arg8[%c5, %c0_64, %c0_65] : memref<8x8x512xf32, #tpu.memory_space<vmem>>, vector<1x8x512xf32>
    %146 = vector.shape_cast %145 : vector<1x8x512xf32> to vector<8x512xf32>
    %147 = arith.truncf %142 : vector<8x128xf32> to vector<8x128xbf16>
    %cst_66 = arith.constant dense<0.000000e+00> : vector<8x512xf32>
    %148 = tpu.matmul %147, %17, %cst_66 {dimension_numbers = #tpu.dot_dimension_numbers<[1], [0], [0], [1], [0, 0, 1, 1], [], []>} : vector<8x128xbf16>, vector<128x512xbf16>, vector<8x512xf32> -> vector<8x512xf32>
    %149 = arith.addf %146, %148 : vector<8x512xf32>
    %150 = vector.extract_strided_slice %149 {offsets = [0, 0], sizes = [8, 384], strides = [1, 1]} : vector<8x512xf32> to vector<8x384xf32>
    %cst_67 = arith.constant 5.000000e-01 : f32
    %151 = vector.broadcast %cst_67 : f32 to vector<8x384xf32>
    %152 = arith.mulf %151, %150 : vector<8x384xf32>
    %153 = math.tanh %152 : vector<8x384xf32>
    %cst_68 = arith.constant 5.000000e-01 : f32
    %154 = vector.broadcast %cst_68 : f32 to vector<8x384xf32>
    %155 = arith.mulf %153, %154 : vector<8x384xf32>
    %cst_69 = arith.constant 5.000000e-01 : f32
    %156 = vector.broadcast %cst_69 : f32 to vector<8x384xf32>
    %157 = arith.addf %155, %156 : vector<8x384xf32>
    %158 = vector.extract_strided_slice %157 {offsets = [0, 0], sizes = [8, 128], strides = [1, 1]} : vector<8x384xf32> to vector<8x128xf32>
    %159 = vector.extract_strided_slice %157 {offsets = [0, 128], sizes = [8, 128], strides = [1, 1]} : vector<8x384xf32> to vector<8x128xf32>
    %160 = vector.extract_strided_slice %157 {offsets = [0, 256], sizes = [8, 128], strides = [1, 1]} : vector<8x384xf32> to vector<8x128xf32>
    %161 = vector.extract_strided_slice %149 {offsets = [0, 384], sizes = [8, 128], strides = [1, 1]} : vector<8x512xf32> to vector<8x128xf32>
    %162 = math.tanh %161 : vector<8x128xf32>
    %163 = arith.mulf %159, %140 : vector<8x128xf32>
    %164 = arith.mulf %158, %162 : vector<8x128xf32>
    %165 = arith.addf %163, %164 : vector<8x128xf32>
    %166 = math.tanh %165 : vector<8x128xf32>
    %167 = arith.mulf %160, %166 : vector<8x128xf32>
    %168 = vector.shape_cast %167 : vector<8x128xf32> to vector<8x1x128xf32>
    %c0_70 = arith.constant 0 : index
    %c5_71 = arith.constant 5 : index
    %c0_72 = arith.constant 0 : index
    %169 = vector.load %arg5[%c0_70, %c5_71, %c0_72] : memref<8x8x128xf32, #tpu.memory_space<vmem>>, vector<8x1x128xf32>
    tpu.vector_store %arg5[%c0_70, %c5_71, %c0_72], %168 {strides = array<i32>} : memref<8x8x128xf32, #tpu.memory_space<vmem>>, vector<8x1x128xf32>,
    %c6 = arith.constant 6 : index
    %c0_73 = arith.constant 0 : index
    %c0_74 = arith.constant 0 : index
    %170 = vector.load %arg8[%c6, %c0_73, %c0_74] : memref<8x8x512xf32, #tpu.memory_space<vmem>>, vector<1x8x512xf32>
    %171 = vector.shape_cast %170 : vector<1x8x512xf32> to vector<8x512xf32>
    %172 = arith.truncf %167 : vector<8x128xf32> to vector<8x128xbf16>
    %cst_75 = arith.constant dense<0.000000e+00> : vector<8x512xf32>
    %173 = tpu.matmul %172, %17, %cst_75 {dimension_numbers = #tpu.dot_dimension_numbers<[1], [0], [0], [1], [0, 0, 1, 1], [], []>} : vector<8x128xbf16>, vector<128x512xbf16>, vector<8x512xf32> -> vector<8x512xf32>
    %174 = arith.addf %171, %173 : vector<8x512xf32>
    %175 = vector.extract_strided_slice %174 {offsets = [0, 0], sizes = [8, 384], strides = [1, 1]} : vector<8x512xf32> to vector<8x384xf32>
    %cst_76 = arith.constant 5.000000e-01 : f32
    %176 = vector.broadcast %cst_76 : f32 to vector<8x384xf32>
    %177 = arith.mulf %176, %175 : vector<8x384xf32>
    %178 = math.tanh %177 : vector<8x384xf32>
    %cst_77 = arith.constant 5.000000e-01 : f32
    %179 = vector.broadcast %cst_77 : f32 to vector<8x384xf32>
    %180 = arith.mulf %178, %179 : vector<8x384xf32>
    %cst_78 = arith.constant 5.000000e-01 : f32
    %181 = vector.broadcast %cst_78 : f32 to vector<8x384xf32>
    %182 = arith.addf %180, %181 : vector<8x384xf32>
    %183 = vector.extract_strided_slice %182 {offsets = [0, 0], sizes = [8, 128], strides = [1, 1]} : vector<8x384xf32> to vector<8x128xf32>
    %184 = vector.extract_strided_slice %182 {offsets = [0, 128], sizes = [8, 128], strides = [1, 1]} : vector<8x384xf32> to vector<8x128xf32>
    %185 = vector.extract_strided_slice %182 {offsets = [0, 256], sizes = [8, 128], strides = [1, 1]} : vector<8x384xf32> to vector<8x128xf32>
    %186 = vector.extract_strided_slice %174 {offsets = [0, 384], sizes = [8, 128], strides = [1, 1]} : vector<8x512xf32> to vector<8x128xf32>
    %187 = math.tanh %186 : vector<8x128xf32>
    %188 = arith.mulf %184, %165 : vector<8x128xf32>
    %189 = arith.mulf %183, %187 : vector<8x128xf32>
    %190 = arith.addf %188, %189 : vector<8x128xf32>
    %191 = math.tanh %190 : vector<8x128xf32>
    %192 = arith.mulf %185, %191 : vector<8x128xf32>
    %193 = vector.shape_cast %192 : vector<8x128xf32> to vector<8x1x128xf32>
    %c0_79 = arith.constant 0 : index
    %c6_80 = arith.constant 6 : index
    %c0_81 = arith.constant 0 : index
    %194 = vector.load %arg5[%c0_79, %c6_80, %c0_81] : memref<8x8x128xf32, #tpu.memory_space<vmem>>, vector<8x1x128xf32>
    tpu.vector_store %arg5[%c0_79, %c6_80, %c0_81], %193 {strides = array<i32>} : memref<8x8x128xf32, #tpu.memory_space<vmem>>, vector<8x1x128xf32>,
    %c7 = arith.constant 7 : index
    %c0_82 = arith.constant 0 : index
    %c0_83 = arith.constant 0 : index
    %195 = vector.load %arg8[%c7, %c0_82, %c0_83] : memref<8x8x512xf32, #tpu.memory_space<vmem>>, vector<1x8x512xf32>
    %196 = vector.shape_cast %195 : vector<1x8x512xf32> to vector<8x512xf32>
    %197 = arith.truncf %192 : vector<8x128xf32> to vector<8x128xbf16>
    %cst_84 = arith.constant dense<0.000000e+00> : vector<8x512xf32>
    %198 = tpu.matmul %197, %17, %cst_84 {dimension_numbers = #tpu.dot_dimension_numbers<[1], [0], [0], [1], [0, 0, 1, 1], [], []>} : vector<8x128xbf16>, vector<128x512xbf16>, vector<8x512xf32> -> vector<8x512xf32>
    %199 = arith.addf %196, %198 : vector<8x512xf32>
    %200 = vector.extract_strided_slice %199 {offsets = [0, 0], sizes = [8, 384], strides = [1, 1]} : vector<8x512xf32> to vector<8x384xf32>
    %cst_85 = arith.constant 5.000000e-01 : f32
    %201 = vector.broadcast %cst_85 : f32 to vector<8x384xf32>
    %202 = arith.mulf %201, %200 : vector<8x384xf32>
    %203 = math.tanh %202 : vector<8x384xf32>
    %cst_86 = arith.constant 5.000000e-01 : f32
    %204 = vector.broadcast %cst_86 : f32 to vector<8x384xf32>
    %205 = arith.mulf %203, %204 : vector<8x384xf32>
    %cst_87 = arith.constant 5.000000e-01 : f32
    %206 = vector.broadcast %cst_87 : f32 to vector<8x384xf32>
    %207 = arith.addf %205, %206 : vector<8x384xf32>
    %208 = vector.extract_strided_slice %207 {offsets = [0, 0], sizes = [8, 128], strides = [1, 1]} : vector<8x384xf32> to vector<8x128xf32>
    %209 = vector.extract_strided_slice %207 {offsets = [0, 128], sizes = [8, 128], strides = [1, 1]} : vector<8x384xf32> to vector<8x128xf32>
    %210 = vector.extract_strided_slice %207 {offsets = [0, 256], sizes = [8, 128], strides = [1, 1]} : vector<8x384xf32> to vector<8x128xf32>
    %211 = vector.extract_strided_slice %199 {offsets = [0, 384], sizes = [8, 128], strides = [1, 1]} : vector<8x512xf32> to vector<8x128xf32>
    %212 = math.tanh %211 : vector<8x128xf32>
    %213 = arith.mulf %209, %190 : vector<8x128xf32>
    %214 = arith.mulf %208, %212 : vector<8x128xf32>
    %215 = arith.addf %213, %214 : vector<8x128xf32>
    %216 = math.tanh %215 : vector<8x128xf32>
    %217 = arith.mulf %210, %216 : vector<8x128xf32>
    %218 = vector.shape_cast %217 : vector<8x128xf32> to vector<8x1x128xf32>
    %c0_88 = arith.constant 0 : index
    %c7_89 = arith.constant 7 : index
    %c0_90 = arith.constant 0 : index
    %219 = vector.load %arg5[%c0_88, %c7_89, %c0_90] : memref<8x8x128xf32, #tpu.memory_space<vmem>>, vector<8x1x128xf32>
    tpu.vector_store %arg5[%c0_88, %c7_89, %c0_90], %218 {strides = array<i32>} : memref<8x8x128xf32, #tpu.memory_space<vmem>>, vector<8x1x128xf32>,
    %c0_91 = arith.constant 0 : index
    %c0_92 = arith.constant 0 : index
    %220 = vector.load %arg9[%c0_91, %c0_92] : memref<8x128xf32, #tpu.memory_space<vmem>>, vector<8x128xf32>
    tpu.vector_store %arg9[%c0_91, %c0_92], %217 {strides = array<i32>} : memref<8x128xf32, #tpu.memory_space<vmem>>, vector<8x128xf32>,
    %c0_93 = arith.constant 0 : index
    %c0_94 = arith.constant 0 : index
    %221 = vector.load %arg10[%c0_93, %c0_94] : memref<8x128xf32, #tpu.memory_space<vmem>>, vector<8x128xf32>
    tpu.vector_store %arg10[%c0_93, %c0_94], %215 {strides = array<i32>} : memref<8x128xf32, #tpu.memory_space<vmem>>, vector<8x128xf32>,
    %c0_95 = arith.constant 0 : index
    %c0_96 = arith.constant 0 : index
    %222 = vector.load %arg6[%c0_95, %c0_96] : memref<8x128xf32, #tpu.memory_space<vmem>>, vector<8x128xf32>
    tpu.vector_store %arg6[%c0_95, %c0_96], %217 {strides = array<i32>} : memref<8x128xf32, #tpu.memory_space<vmem>>, vector<8x128xf32>,
    %c0_97 = arith.constant 0 : index
    %c0_98 = arith.constant 0 : index
    %223 = vector.load %arg7[%c0_97, %c0_98] : memref<8x128xf32, #tpu.memory_space<vmem>>, vector<8x128xf32>
    tpu.vector_store %arg7[%c0_97, %c0_98], %215 {strides = array<i32>} : memref<8x128xf32, #tpu.memory_space<vmem>>, vector<8x128xf32>,
    return
  }
  func.func @transform_0(%arg0: i32, %arg1: i32) -> (i32, i32, i32) {
    %c0_i32 = arith.constant 0 : i32
    %c0_i32_0 = arith.constant 0 : i32
    return %arg1, %arg0, %c0_i32 : i32, i32, i32
  }
  func.func @transform_1(%arg0: i32, %arg1: i32) -> (i32, i32) {
    %c0_i32 = arith.constant 0 : i32
    %c0_i32_0 = arith.constant 0 : i32
    %c0_i32_1 = arith.constant 0 : i32
    return %c0_i32, %c0_i32_0 : i32, i32
  }
  func.func @transform_2(%arg0: i32, %arg1: i32) -> (i32, i32) {
    %c0_i32 = arith.constant 0 : i32
    %c0_i32_0 = arith.constant 0 : i32
    %c0_i32_1 = arith.constant 0 : i32
    return %c0_i32, %c0_i32_0 : i32, i32
  }
  func.func @transform_3(%arg0: i32, %arg1: i32) -> (i32, i32, i32) {
    %c0_i32 = arith.constant 0 : i32
    %c0_i32_0 = arith.constant 0 : i32
    return %arg0, %arg1, %c0_i32 : i32, i32, i32
  }
  func.func @transform_4(%arg0: i32, %arg1: i32) -> (i32, i32) {
    %c0_i32 = arith.constant 0 : i32
    %c0_i32_0 = arith.constant 0 : i32
    return %arg0, %c0_i32 : i32, i32
  }
  func.func @transform_5(%arg0: i32, %arg1: i32) -> (i32, i32) {
    %c0_i32 = arith.constant 0 : i32
    %c0_i32_0 = arith.constant 0 : i32
    return %arg0, %c0_i32 : i32, i32
  }
}

</mosaic_0001>

<bundles_post_ra>
// kernel: tpu_custom_call.1
= control target key start
LH: loop header
LB: loop body
LE: loop exit
PB: predicated region body
PF: predicated region fallthrough
CT: control target
= control target key end

     0   :  { %11 = vsyncpa [#allocation6], 0  ;;  %s2232_s0 = inlined_call_operand.vmem [shape: f32[8,8,2], index: 0, kind: input, shape index: {}]   ;;  %s2233_s1 = inlined_call_operand.vmem [shape: f32[2,512], index: 1, kind: input, shape index: {}]   ;;  %s2234_s2 = inlined_call_operand.hbm [shape: bf16[128,512], index: 2, kind: input, shape index: {}]   ;;  %s2235_s3 = inlined_call_operand.hbm [shape: f32[8,8,128], index: 3, kind: output, shape index: {0}]   ;;  %s2236_s4 = inlined_call_operand.hbm [shape: f32[8,128], index: 4, kind: output, shape index: {1}]   ;;  %s2237_s5 = inlined_call_operand.hbm [shape: f32[8,128], index: 5, kind: output, shape index: {2}]  }
   0x1   :  { %12 = vsyncpa [#allocation7], 0 }
   0x2   :  { %13 = vsyncpa [#allocation10], 0  ;;  %s22_s20 = sshll.u32 %s2234_s2, 4  ;;  %s1708_s21 = smov [#allocation5]   ;;  %s23_s20 = int_to_ptr.hbm [resolvable:$true] %s22_s20 }
   0x3   :  { %s24_s22 = sshll.u32 %s1708_s21, 4  ;;  %s1709_s23 = smov 256   ;;  %s25_s22 = int_to_ptr.vmem [resolvable:$true] %s24_s22 }
   0x4   :  { %s1710_s24 = smov 16  }
   0x5   :  { %30 = dma.hbm_to_vmem [thread:$0]  %s23_s20, 4096, %s25_s22, [#allocation6], %s1709_s23, %s1709_s23, %s1710_s24  }
   0x6   :  { %1702 = dma.done.wait [#allocation6], 4096  }
   0x7   :  { %1703 = vsyncadd [#allocation6], 4294963200  ;;  %v2238_v0 = vmov 0   ;;  %v1456_v1 = vld [vmem:[#allocation5 + $0xe0] sm:$0xf]  ;;  %s1311_s21 = sshll.u32 %s2236_s4, 4  ;;  %s1312_s21 = int_to_ptr.hbm [resolvable:$true] %s1311_s21 }
   0x8   :  { %1513 = vset.pattern.permute.xlu0 %v2238_v0  ;;  %1515 = vset.pattern.permute.xlu1 %v2238_v0  ;;  %v1500_v2 = vld [vmem:[#allocation5 + $0xec] sm:$0xf0]  ;;  %v1498_v3 = vld [vmem:[#allocation5 + $0xe4] sm:$0xf]  ;;  %v1458_v5 = vld [vmem:[#allocation5 + $0xf0] sm:$0xf0] }
   0x9   :  { %1517 = vset.pattern.permute.xlu2 %v2238_v0  ;;  %v1755_v4 = vor.u32 %v1500_v2, %v1456_v1  ;;  %v1464_v6 = vld [vmem:[#allocation5 + $0xe8] sm:$0xf]  ;;  %v1501_v7 = vld [vmem:[#allocation5 + $0xf4] sm:$0xf0]  ;;  %v1757_v8 = vor.u32 %v1498_v3, %v1458_v5  ;;  %v1499_v10 = vld [vmem:[#allocation5 + $0xec] sm:$0xf] }
   0xa   :  { %v1759_v9 = vor.u32 %v1501_v7, %v1464_v6  ;;  %v1466_v11 = vld [vmem:[#allocation5 + $0xf8] sm:$0xf0]  ;;  %v1440_v12 = vld [vmem:[#allocation5 + $0xc0] sm:$0xf]  ;;  %v1496_v14 = vld [vmem:[#allocation5 + $0xcc] sm:$0xf0] }
   0xb   :  { %469 = vmatpush.bf16.msra.mxu0 %v1755_v4  ;;  %v1762_v13 = vor.u32 %v1499_v10, %v1466_v11  ;;  %v1494_v15 = vld [vmem:[#allocation5 + $0xc4] sm:$0xf]  ;;  %v1442_v16 = vld [vmem:[#allocation5 + $0xd0] sm:$0xf0]  ;;  %482 = vmatpush.bf16.msra.mxu1 %v1757_v8  ;;  %v1766_v17 = vor.u32 %v1496_v14, %v1440_v12  ;;  %v1448_v19 = vld [vmem:[#allocation5 + $0xc8] sm:$0xf] }
   0xc   :  { %495 = vmatpush.bf16.msra.mxu2 %v1759_v9  ;;  %v1768_v18 = vor.u32 %v1494_v15, %v1442_v16  ;;  %v1497_v20 = vld [vmem:[#allocation5 + $0xd4] sm:$0xf0]  ;;  %v1495_v21 = vld [vmem:[#allocation5 + $0xcc] sm:$0xf]  ;;  %v1450_v23 = vld [vmem:[#allocation5 + $0xd8] sm:$0xf0] }
   0xd   :  { %508 = vmatpush.bf16.msra.mxu3 %v1762_v13  ;;  %v1771_v22 = vor.u32 %v1497_v20, %v1448_v19  ;;  %v1424_v24 = vld [vmem:[#allocation5 + $0xa0] sm:$0xf]  ;;  %v1492_v25 = vld [vmem:[#allocation5 + $0xac] sm:$0xf0]  ;;  %v1773_v26 = vor.u32 %v1495_v21, %v1450_v23  ;;  %v1490_v27 = vld [vmem:[#allocation5 + $0xa4] sm:$0xf] }
   0xe   :  { %v1426_v28 = vld [vmem:[#allocation5 + $0xb0] sm:$0xf0]  ;;  %v1432_v29 = vld [vmem:[#allocation5 + $0xa8] sm:$0xf]  ;;  %v1776_v30 = vor.u32 %v1492_v25, %v1424_v24  ;;  %v1493_v31 = vld [vmem:[#allocation5 + $0xb4] sm:$0xf0] }
   0xf   :  { %470 = vmatpush.bf16.msra.mxu0 %v1766_v17  ;;  %v1491_v32 = vld [vmem:[#allocation5 + $0xac] sm:$0xf]  ;;  %v1434_v33 = vld [vmem:[#allocation5 + $0xb8] sm:$0xf0]  ;;  %483 = vmatpush.bf16.msra.mxu1 %v1768_v18  ;;  %v1780_v34 = vor.u32 %v1490_v27, %v1426_v28  ;;  %v1782_v35 = vor.u32 %v1493_v31, %v1432_v29  ;;  %v1408_v36 = vld [vmem:[#allocation5 + $0x80] sm:$0xf] }
  0x10   :  { %496 = vmatpush.bf16.msra.mxu2 %v1771_v22  ;;  %v1488_v37 = vld [vmem:[#allocation5 + $0x8c] sm:$0xf0]  ;;  %v1486_v38 = vld [vmem:[#allocation5 + $0x84] sm:$0xf]  ;;  %v1785_v39 = vor.u32 %v1491_v32, %v1434_v33  ;;  %v1410_v40 = vld [vmem:[#allocation5 + $0x90] sm:$0xf0] }
  0x11   :  { %509 = vmatpush.bf16.msra.mxu3 %v1773_v26  ;;  %v1416_v41 = vld [vmem:[#allocation5 + $0x88] sm:$0xf]  ;;  %v1489_v42 = vld [vmem:[#allocation5 + $0x94] sm:$0xf0]  ;;  %v1487_v43 = vld [vmem:[#allocation5 + $0x8c] sm:$0xf]  ;;  %v1788_v45 = vor.u32 %v1488_v37, %v1408_v36  ;;  %v1792_v46 = vor.u32 %v1486_v38, %v1410_v40 }
  0x12   :  { %v1418_v44 = vld [vmem:[#allocation5 + $0x98] sm:$0xf0]  ;;  %v1794_v47 = vor.u32 %v1489_v42, %v1416_v41  ;;  %v1392_v48 = vld [vmem:[#allocation5 + $0x60] sm:$0xf]  ;;  %v1484_v49 = vld [vmem:[#allocation5 + $0x6c] sm:$0xf0] }
  0x13   :  { %471 = vmatpush.bf16.msra.mxu0 %v1776_v30  ;;  %484 = vmatpush.bf16.msra.mxu1 %v1780_v34  ;;  %v1482_v50 = vld [vmem:[#allocation5 + $0x64] sm:$0xf]  ;;  %v1797_v51 = vor.u32 %v1487_v43, %v1418_v44  ;;  %v1394_v52 = vld [vmem:[#allocation5 + $0x70] sm:$0xf0]  ;;  %v1400_v53 = vld [vmem:[#allocation5 + $0x68] sm:$0xf]  ;;  %v1800_v57 = vor.u32 %v1484_v49, %v1392_v48 }
  0x14   :  { %497 = vmatpush.bf16.msra.mxu2 %v1782_v35  ;;  %v1485_v54 = vld [vmem:[#allocation5 + $0x74] sm:$0xf0]  ;;  %v1483_v55 = vld [vmem:[#allocation5 + $0x6c] sm:$0xf]  ;;  %v1402_v56 = vld [vmem:[#allocation5 + $0x78] sm:$0xf0]  ;;  %v1804_v59 = vor.u32 %v1482_v50, %v1394_v52 }
  0x15   :  { %510 = vmatpush.bf16.msra.mxu3 %v1785_v39  ;;  %v1376_v58 = vld [vmem:[#allocation5 + $0x40] sm:$0xf]  ;;  %v1806_v60 = vor.u32 %v1485_v54, %v1400_v53  ;;  %v1480_v61 = vld [vmem:[#allocation5 + $0x4c] sm:$0xf0]  ;;  %v1478_v62 = vld [vmem:[#allocation5 + $0x44] sm:$0xf]  ;;  %v1812_v1 = vor.u32 %v1483_v55, %v1402_v56 }
  0x16   :  { %v41_v63 = vld [vmem:[%s2232_s0] sm:$0xff]  ;;  %v1378_v2 = vld [vmem:[#allocation5 + $0x50] sm:$0xf0]  ;;  %v1384_v3 = vld [vmem:[#allocation5 + $0x48] sm:$0xf]  ;;  %v1815_v10 = vor.u32 %v1480_v61, %v1376_v58  ;;  %v1712_v41 = vmov 1  }
  0x17   :  { %472 = vmatpush.bf16.msra.mxu0 %v1788_v45  ;;  %485 = vmatpush.bf16.msra.mxu1 %v1792_v46  ;;  %v1481_v5 = vld [vmem:[#allocation5 + $0x54] sm:$0xf0]  ;;  %v1479_v6 = vld [vmem:[#allocation5 + $0x4c] sm:$0xf]  ;;  %v1386_v7 = vld [vmem:[#allocation5 + $0x58] sm:$0xf0]  ;;  %v1819_v11 = vor.u32 %v1478_v62, %v1378_v2 }
  0x18   :  { %498 = vmatpush.bf16.msra.mxu2 %v1794_v47  ;;  %52 = vperm.xlu0 %1513, %v41_v63   ;;  %v1821_v12 = vor.u32 %v1481_v5, %v1384_v3  ;;  %v1360_v14 = vld [vmem:[#allocation5 + $0x20] sm:$0xf]  ;;  %v1476_v15 = vld [vmem:[#allocation5 + $0x2c] sm:$0xf0]  ;;  %v1474_v16 = vld [vmem:[#allocation5 + $0x24] sm:$0xf]  ;;  %v1824_v19 = vor.u32 %v1479_v6, %v1386_v7 }
  0x19   :  { %511 = vmatpush.bf16.msra.mxu3 %v1797_v51  ;;  %v1362_v20 = vld [vmem:[#allocation5 + $0x30] sm:$0xf0]  ;;  %v1368_v21 = vld [vmem:[#allocation5 + $0x28] sm:$0xf]  ;;  %v1477_v23 = vld [vmem:[#allocation5 + $0x34] sm:$0xf0]  ;;  %v1827_v27 = vor.u32 %v1476_v15, %v1360_v14 }
  0x1a   :  { %v1475_v24 = vld [vmem:[#allocation5 + $0x2c] sm:$0xf]  ;;  %v1370_v25 = vld [vmem:[#allocation5 + $0x38] sm:$0xf0]  ;;  %v1831_v28 = vor.u32 %v1474_v16, %v1362_v20  ;;  %v1833_v29 = vor.u32 %v1477_v23, %v1368_v21  ;;  %v1344_v31 = vld [vmem:[#allocation5] sm:$0xf] }
  0x1b   :  { %473 = vmatpush.bf16.msra.mxu0 %v1800_v57  ;;  %486 = vmatpush.bf16.msra.mxu1 %v1804_v59  ;;  %v1472_v32 = vld [vmem:[#allocation5 + $0xc] sm:$0xf0]  ;;  %v1470_v33 = vld [vmem:[#allocation5 + $0x4] sm:$0xf]  ;;  %v1836_v36 = vor.u32 %v1475_v24, %v1370_v25  ;;  %v1346_v37 = vld [vmem:[#allocation5 + $0x10] sm:$0xf0] }
  0x1c   :  { %499 = vmatpush.bf16.msra.mxu2 %v1806_v60  ;;  %v1352_v38 = vld [vmem:[#allocation5 + $0x8] sm:$0xf]  ;;  %v1473_v40 = vld [vmem:[#allocation5 + $0x14] sm:$0xf0]  ;;  %v1471_v42 = vld [vmem:[#allocation5 + $0xc] sm:$0xf]  ;;  %v1840_v44 = vor.u32 %v1472_v32, %v1344_v31  ;;  %v1844_v48 = vor.u32 %v1470_v33, %v1346_v37 }
  0x1d   :  { %512 = vmatpush.bf16.msra.mxu3 %v1812_v1  ;;  %v1354_v43 = vld [vmem:[#allocation5 + $0x18] sm:$0xf0]  ;;  %v1846_v49 = vor.u32 %v1473_v40, %v1352_v38  ;;  %v1713_v52 = vmov 0.0|0.0   ;;  %v49_v54 = vld [vmem:[%s2233_s1] ss:$2 sm:$0xf] }
  0x1e   :  { %v1849_v50 = vor.u32 %v1471_v42, %v1354_v43  ;;  %v1341_v55 = vld [vmem:[%s2233_s1 + $0x1] ss:$2 sm:$0xf]  ;;  %v1926_v56 = vperm.slane %v49_v54, 0  ;;  %v1930_v62 = vperm.slane %v49_v54, 1  ;;  %v42_v5 = vld [vmem:[%s2232_s0 + $0x8] sm:$0xff] }
  0x1f   :  { %474 = vmatpush.bf16.msra.mxu0 %v1815_v10  ;;  %487 = vmatpush.bf16.msra.mxu1 %v1819_v11  ;;  %v1928_v58 = vperm.slane %v1341_v55, 0  ;;  %v1941_v14 = vperm.slane %v49_v54, 2  ;;  %v1943_v15 = vperm.slane %v1341_v55, 2  ;;  %v1945_v20 = vperm.slane %v49_v54, 3  ;;  %s1715_s22 = smov [#allocation11]   ;;  %s1322_s25 = sshll.u32 %s2237_s5, 4  ;;  %s1323_s25 = int_to_ptr.hbm [resolvable:$true] %s1322_s25 }
  0x20   :  { %500 = vmatpush.bf16.msra.mxu2 %v1821_v12  ;;  %1514 = vset.pattern.permute.xlu0 %v1712_v41  ;;  %v1947_v21 = vperm.slane %v1341_v55, 3  ;;  %s1320_s23 = sshll.u32 %s1715_s22, 4  ;;  %s1716_s26 = smov [#allocation8]   ;;  %s1321_s23 = int_to_ptr.vmem [resolvable:$true] %s1320_s23 }
  0x21   :  { %513 = vmatpush.bf16.msra.mxu3 %v1824_v19  ;;  %134 = vperm.xlu0 %1514, %v41_v63   ;;  %v1932_v63 = vperm.slane %v1341_v55, 1  ;;  %s1295_s4 = sshll.u32 %s1716_s26, 4  ;;  %s1297_s29 = sshll.u32 %s2235_s3, 4  ;;  %s1296_s4 = int_to_ptr.vmem [resolvable:$true] %s1295_s4  ;;  %s1298_s29 = int_to_ptr.hbm [resolvable:$true] %s1297_s29 }
  0x22   :  { %57 = vperm.xlu1 %1515, %v42_v5   ;;  %s1717_s5 = smov 128   ;;  %s1718_s30 = smov 8  }
  0x23   :  { %475 = vmatpush.bf16.msra.mxu0 %v1827_v27  ;;  %488 = vmatpush.bf16.msra.mxu1 %v1831_v28 }
  0x24   :  { %501 = vmatpush.bf16.msra.mxu2 %v1833_v29 }
  0x25   :  { %514 = vmatpush.bf16.msra.mxu3 %v1836_v36 }
  0x27   :  { %476 = vmatpush.bf16.msra.mxu0 %v1840_v44  ;;  %489 = vmatpush.bf16.msra.mxu1 %v1844_v48 }
  0x28   :  { %502 = vmatpush.bf16.msra.mxu2 %v1846_v49 }
  0x29   :  { %515 = vmatpush.bf16.msra.mxu3 %v1849_v50  ;;  %1520 = vset.pattern.permute.xlu0 %v2238_v0 }
  0x2a   :  { %477 = vmatmul.bf16.vlgmr.msra.gmra.mxu0 %v1713_v52  ;;  %490 = vmatmul.bf16.vlgmr.msra.gmra.mxu1 %v1713_v52 }
  0x2b   :  { %572 = vmatpush.bf16.msrb.mxu0 %v1755_v4  ;;  %585 = vmatpush.bf16.msrb.mxu1 %v1757_v8 }
  0x2c   :  { %503 = vmatmul.bf16.vlgmr.msra.gmra.mxu2 %v1713_v52  ;;  %516 = vmatmul.bf16.vlgmr.msra.gmra.mxu3 %v1713_v52 }
  0x2d   :  { %598 = vmatpush.bf16.msrb.mxu2 %v1759_v9  ;;  %611 = vmatpush.bf16.msrb.mxu3 %v1762_v13 }
  0x2e   :  { %1516 = vset.pattern.permute.xlu1 %v1712_v41 }
  0x2f   :  { %573 = vmatpush.bf16.msrb.mxu0 %v1766_v17  ;;  %586 = vmatpush.bf16.msrb.mxu1 %v1768_v18 }
  0x30   :  { %138 = vperm.xlu1 %1516, %v42_v5  }
  0x31   :  { %599 = vmatpush.bf16.msrb.mxu2 %v1771_v22  ;;  %612 = vmatpush.bf16.msrb.mxu3 %v1773_v26 }
  0x33   :  { %574 = vmatpush.bf16.msrb.mxu0 %v1776_v30  ;;  %587 = vmatpush.bf16.msrb.mxu1 %v1780_v34 }
  0x35   :  { %600 = vmatpush.bf16.msrb.mxu2 %v1782_v35  ;;  %613 = vmatpush.bf16.msrb.mxu3 %v1785_v39 }
  0x37   :  { %575 = vmatpush.bf16.msrb.mxu0 %v1788_v45  ;;  %588 = vmatpush.bf16.msrb.mxu1 %v1792_v46 }
  0x38   :  { %1519 = vset.pattern.permute.xlu1 %v2238_v0 }
  0x39   :  { %601 = vmatpush.bf16.msrb.mxu2 %v1794_v47  ;;  %614 = vmatpush.bf16.msrb.mxu3 %v1797_v51 }
  0x3b   :  { %576 = vmatpush.bf16.msrb.mxu0 %v1800_v57  ;;  %589 = vmatpush.bf16.msrb.mxu1 %v1804_v59 }
  0x3d   :  { %602 = vmatpush.bf16.msrb.mxu2 %v1806_v60  ;;  %615 = vmatpush.bf16.msrb.mxu3 %v1812_v1 }
  0x3f   :  { %577 = vmatpush.bf16.msrb.mxu0 %v1815_v10  ;;  %590 = vmatpush.bf16.msrb.mxu1 %v1819_v11 }
  0x41   :  { %603 = vmatpush.bf16.msrb.mxu2 %v1821_v12  ;;  %616 = vmatpush.bf16.msrb.mxu3 %v1824_v19 }
  0x43   :  { %578 = vmatpush.bf16.msrb.mxu0 %v1827_v27  ;;  %591 = vmatpush.bf16.msrb.mxu1 %v1831_v28 }
  0x45   :  { %604 = vmatpush.bf16.msrb.mxu2 %v1833_v29  ;;  %617 = vmatpush.bf16.msrb.mxu3 %v1836_v36 }
  0x47   :  { %579 = vmatpush.bf16.msrb.mxu0 %v1840_v44  ;;  %592 = vmatpush.bf16.msrb.mxu1 %v1844_v48 }
  0x49   :  { %605 = vmatpush.bf16.msrb.mxu2 %v1846_v49  ;;  %618 = vmatpush.bf16.msrb.mxu3 %v1849_v50 }
  0x4b   :  { %675 = vmatpush.bf16.msra.mxu0 %v1755_v4  ;;  %688 = vmatpush.bf16.msra.mxu1 %v1757_v8 }
  0x4d   :  { %701 = vmatpush.bf16.msra.mxu2 %v1759_v9  ;;  %714 = vmatpush.bf16.msra.mxu3 %v1762_v13 }
  0x4f   :  { %676 = vmatpush.bf16.msra.mxu0 %v1766_v17  ;;  %689 = vmatpush.bf16.msra.mxu1 %v1768_v18 }
  0x51   :  { %702 = vmatpush.bf16.msra.mxu2 %v1771_v22  ;;  %715 = vmatpush.bf16.msra.mxu3 %v1773_v26 }
  0x53   :  { %677 = vmatpush.bf16.msra.mxu0 %v1776_v30  ;;  %690 = vmatpush.bf16.msra.mxu1 %v1780_v34 }
  0x55   :  { %703 = vmatpush.bf16.msra.mxu2 %v1782_v35  ;;  %716 = vmatpush.bf16.msra.mxu3 %v1785_v39 }
  0x57   :  { %678 = vmatpush.bf16.msra.mxu0 %v1788_v45  ;;  %691 = vmatpush.bf16.msra.mxu1 %v1792_v46 }
  0x59   :  { %704 = vmatpush.bf16.msra.mxu2 %v1794_v47  ;;  %717 = vmatpush.bf16.msra.mxu3 %v1797_v51 }
  0x5b   :  { %679 = vmatpush.bf16.msra.mxu0 %v1800_v57  ;;  %692 = vmatpush.bf16.msra.mxu1 %v1804_v59 }
  0x5d   :  { %705 = vmatpush.bf16.msra.mxu2 %v1806_v60  ;;  %718 = vmatpush.bf16.msra.mxu3 %v1812_v1 }
  0x5f   :  { %680 = vmatpush.bf16.msra.mxu0 %v1815_v10  ;;  %693 = vmatpush.bf16.msra.mxu1 %v1819_v11 }
  0x61   :  { %706 = vmatpush.bf16.msra.mxu2 %v1821_v12  ;;  %719 = vmatpush.bf16.msra.mxu3 %v1824_v19 }
  0x63   :  { %681 = vmatpush.bf16.msra.mxu0 %v1827_v27  ;;  %694 = vmatpush.bf16.msra.mxu1 %v1831_v28 }
  0x65   :  { %707 = vmatpush.bf16.msra.mxu2 %v1833_v29  ;;  %720 = vmatpush.bf16.msra.mxu3 %v1836_v36 }
  0x67   :  { %682 = vmatpush.bf16.msra.mxu0 %v1840_v44  ;;  %695 = vmatpush.bf16.msra.mxu1 %v1844_v48 }
  0x69   :  { %708 = vmatpush.bf16.msra.mxu2 %v1846_v49  ;;  %721 = vmatpush.bf16.msra.mxu3 %v1849_v50 }
  0x8a   :  { %v53_v53 = vpop.permute.xlu0 %52 }
  0x8b   :  { %v99_v2 = vmul.f32 %v1926_v56, %v53_v53  ;;  %v100_v6 = vmul.f32 %v1930_v62, %v53_v53  ;;  %v101_v33 = vmul.f32 %v1941_v14, %v53_v53  ;;  %v102_v40 = vmul.f32 %v1945_v20, %v53_v53 }
  0x93   :  { %v135_v61 = vpop.permute.xlu0 %134 }
  0x94   :  { %v174_v3 = vmul.f32 %v1928_v58, %v135_v61  ;;  %v175_v7 = vmul.f32 %v1932_v63, %v135_v61  ;;  %v176_v37 = vmul.f32 %v1943_v15, %v135_v61  ;;  %v177_v42 = vmul.f32 %v1947_v21, %v135_v61 }
  0x96   :  { %v206_v16 = vadd.f32 %v174_v3, %v99_v2  ;;  %v207_v24 = vadd.f32 %v175_v7, %v100_v6  ;;  %v208_v52 = vadd.f32 %v176_v37, %v101_v33  ;;  %v209_v55 = vadd.f32 %v177_v42, %v102_v40 }
  0xa7   :  { %v478_v23 = vpop.f32.mrf.mxu0  ;;  %v491_v31 = vpop.f32.mrf.mxu1 }
  0xa8   :  { %v521_v25 = vadd.f32 %v478_v23, %v206_v16  ;;  %v522_v32 = vadd.f32 %v491_v31, %v207_v24 }
  0xaa   :  { %v525_v38 = vmul.f32 0.5, %v521_v25  ;;  %v526_v43 = vmul.f32 0.5, %v522_v32 }
  0xac   :  { %1526 = vtanh.f32 %v525_v38 }
  0xad   :  { %1528 = vtanh.f32 %v526_v43 }
  0xaf   :  { %v504_v54 = vpop.f32.mrf.mxu2  ;;  %v517_v3 = vpop.f32.mrf.mxu3 }
  0xb0   :  { %v523_v2 = vadd.f32 %v504_v54, %v208_v52  ;;  %v480_v6 = vpop.f32.mrf.mxu0  ;;  %v524_v7 = vadd.f32 %v517_v3, %v209_v55  ;;  %v493_v16 = vpop.f32.mrf.mxu1 }
  0xb2   :  { %v527_v23 = vmul.f32 0.5, %v523_v2  ;;  %v1527_v24 = vpop.eup %1526  ;;  %1530 = vtanh.f32 %v524_v7 }
  0xb3   :  { %v1529_v53 = vpop.eup %1528  ;;  %v531_v25 = vmul.f32 0.5, %v1527_v24 }
  0xb4   :  { %v532_v61 = vmul.f32 0.5, %v1529_v53  ;;  %1532 = vtanh.f32 %v527_v23 }
  0xb5   :  { %v534_v31 = vadd.f32 0.5, %v531_v25 }
  0xb6   :  { %v535_v5 = vadd.f32 0.5, %v532_v61  ;;  %v58_v61 = vpop.permute.xlu1 %57 }
  0xb7   :  { %v506_v32 = vpop.f32.mrf.mxu2  ;;  %v519_v33 = vpop.f32.mrf.mxu3 }
  0xb8   :  { %v1531_v37 = vpop.eup %1530  ;;  %v538_v38 = vmul.f32 0.0, %v535_v5  ;;  %v103_v5 = vmul.f32 %v1926_v56, %v58_v61  ;;  %v104_v33 = vmul.f32 %v1930_v62, %v58_v61 }
  0xb9   :  { %v539_v40 = vmul.f32 %v1531_v37, %v534_v31 }
  0xba   :  { %v1533_v42 = vpop.eup %1532 }
  0xbb   :  { %v1955_v43 = vadd.f32 %v539_v40, %v538_v38  ;;  %v533_v52 = vmul.f32 0.5, %v1533_v42 }
  0xbd   :  { %1534 = vtanh.f32 %v1955_v43  ;;  %v536_v54 = vadd.f32 0.5, %v533_v52 }
  0xbe   :  { %v139_v31 = vpop.permute.xlu1 %138 }
  0xbf   :  { %v178_v32 = vmul.f32 %v1928_v58, %v139_v31  ;;  %v179_v37 = vmul.f32 %v1932_v63, %v139_v31 }
  0xc1   :  { %v210_v38 = vadd.f32 %v178_v32, %v103_v5  ;;  %v211_v40 = vadd.f32 %v179_v37, %v104_v33  ;;  %v43_v5 = vld [vmem:[%s2232_s0 + $0x10] sm:$0xff] }
  0xc2   :  { %62 = vperm.xlu2 %1517, %v43_v5  }
  0xc3   :  { %v1535_v55 = vpop.eup %1534 }
  0xc4   :  { %v542_v2 = vmul.f32 %v1535_v55, %v536_v54 }
  0xc6   :  { %v544_v3 = vrot.slane %v542_v2, 1  ;;  %v545_v6 = vrot.slane %v542_v2, 2  ;;  %v546_v7 = vrot.slane %v542_v2, 3  ;;  %558 = vst [vmem:[#allocation8] sm:$0x1] %v542_v2  ;;  %v547_v16 = vrot.slane %v542_v2, 4 }
  0xc7   :  { %v571_v23 = vpack.c.bf16 %v542_v2, %v542_v2  ;;  %v548_v24 = vrot.slane %v542_v2, 5  ;;  %v549_v53 = vrot.slane %v542_v2, 6  ;;  %v550_v25 = vrot.slane %v542_v2, 7 }
  0xc8   :  { %559 = vst [vmem:[#allocation8 + $0x8] sm:$0x1] %v544_v3  ;;  %v105_v2 = vmul.f32 %v1941_v14, %v58_v61  ;;  %v180_v3 = vmul.f32 %v1943_v15, %v139_v31 }
  0xc9   :  { %560 = vst [vmem:[#allocation8 + $0x10] sm:$0x1] %v545_v6  ;;  %580 = vmatmul.bf16.vlgmr.msrb.gmra.mxu0 %v571_v23  ;;  %593 = vmatmul.bf16.vlgmr.msrb.gmra.mxu1 %v571_v23  ;;  %v106_v6 = vmul.f32 %v1945_v20, %v58_v61 }
  0xca   :  { %561 = vst [vmem:[#allocation8 + $0x18] sm:$0x1] %v546_v7  ;;  %606 = vmatmul.bf16.vlgmr.msrb.gmra.mxu2 %v571_v23  ;;  %619 = vmatmul.bf16.vlgmr.msrb.gmra.mxu3 %v571_v23  ;;  %v181_v7 = vmul.f32 %v1947_v21, %v139_v31 }
  0xcb   :  { %562 = vst [vmem:[#allocation8 + $0x20] sm:$0x1] %v547_v16  ;;  %778 = vmatpush.bf16.msrb.mxu0 %v1755_v4  ;;  %791 = vmatpush.bf16.msrb.mxu1 %v1757_v8 }
  0xcc   :  { %563 = vst [vmem:[#allocation8 + $0x28] sm:$0x1] %v548_v24  ;;  %804 = vmatpush.bf16.msrb.mxu2 %v1759_v9  ;;  %817 = vmatpush.bf16.msrb.mxu3 %v1762_v13  ;;  %v212_v24 = vadd.f32 %v180_v3, %v105_v2 }
  0xcd   :  { %564 = vst [vmem:[#allocation8 + $0x30] sm:$0x1] %v549_v53  ;;  %v213_v53 = vadd.f32 %v181_v7, %v106_v6  ;;  %1518 = vset.pattern.permute.xlu2 %v1712_v41 }
  0xce   :  { %565 = vst [vmem:[#allocation8 + $0x38] sm:$0x1] %v550_v25  ;;  %v44_v25 = vld [vmem:[%s2232_s0 + $0x18] sm:$0xff]  ;;  %142 = vperm.xlu2 %1518, %v43_v5  }
  0xcf   :  { %779 = vmatpush.bf16.msrb.mxu0 %v1766_v17  ;;  %792 = vmatpush.bf16.msrb.mxu1 %v1768_v18 }
  0xd0   :  { %805 = vmatpush.bf16.msrb.mxu2 %v1771_v22  ;;  %818 = vmatpush.bf16.msrb.mxu3 %v1773_v26 }
  0xd1   :  { %67 = vperm.xlu1 %1519, %v44_v25  }
  0xd3   :  { %780 = vmatpush.bf16.msrb.mxu0 %v1776_v30  ;;  %793 = vmatpush.bf16.msrb.mxu1 %v1780_v34 }
  0xd4   :  { %806 = vmatpush.bf16.msrb.mxu2 %v1782_v35  ;;  %819 = vmatpush.bf16.msrb.mxu3 %v1785_v39 }
  0xd6   :  { %146 = vperm.xlu2 %1518, %v44_v25  }
  0xd7   :  { %781 = vmatpush.bf16.msrb.mxu0 %v1788_v45  ;;  %794 = vmatpush.bf16.msrb.mxu1 %v1792_v46 }
  0xd8   :  { %807 = vmatpush.bf16.msrb.mxu2 %v1794_v47  ;;  %820 = vmatpush.bf16.msrb.mxu3 %v1797_v51 }
  0xd9   :  { %1521 = vset.pattern.permute.xlu1 %v1712_v41 }
  0xdb   :  { %782 = vmatpush.bf16.msrb.mxu0 %v1800_v57  ;;  %795 = vmatpush.bf16.msrb.mxu1 %v1804_v59 }
  0xdc   :  { %808 = vmatpush.bf16.msrb.mxu2 %v1806_v60  ;;  %821 = vmatpush.bf16.msrb.mxu3 %v1812_v1 }
  0xde   :  { %1522 = vset.pattern.permute.xlu2 %v2238_v0 }
  0xdf   :  { %783 = vmatpush.bf16.msrb.mxu0 %v1815_v10  ;;  %796 = vmatpush.bf16.msrb.mxu1 %v1819_v11 }
  0xe0   :  { %809 = vmatpush.bf16.msrb.mxu2 %v1821_v12  ;;  %822 = vmatpush.bf16.msrb.mxu3 %v1824_v19 }
  0xe3   :  { %784 = vmatpush.bf16.msrb.mxu0 %v1827_v27  ;;  %797 = vmatpush.bf16.msrb.mxu1 %v1831_v28 }
  0xe4   :  { %810 = vmatpush.bf16.msrb.mxu2 %v1833_v29  ;;  %823 = vmatpush.bf16.msrb.mxu3 %v1836_v36 }
  0xe7   :  { %785 = vmatpush.bf16.msrb.mxu0 %v1840_v44  ;;  %798 = vmatpush.bf16.msrb.mxu1 %v1844_v48 }
  0xe8   :  { %811 = vmatpush.bf16.msrb.mxu2 %v1846_v49  ;;  %824 = vmatpush.bf16.msrb.mxu3 %v1849_v50 }
 0x11c   :  { %v63_v25 = vpop.permute.xlu2 %62 }
 0x146   :  { %v581_v42 = vpop.f32.mrf.mxu0  ;;  %v594_v52 = vpop.f32.mrf.mxu1 }
 0x147   :  { %v624_v54 = vadd.f32 %v581_v42, %v210_v38  ;;  %v625_v55 = vadd.f32 %v594_v52, %v211_v40 }
 0x149   :  { %v628_v16 = vmul.f32 0.5, %v624_v54  ;;  %v629_v23 = vmul.f32 0.5, %v625_v55 }
 0x14b   :  { %1536 = vtanh.f32 %v628_v16 }
 0x14c   :  { %1538 = vtanh.f32 %v629_v23 }
 0x14d   :  { %v607_v32 = vpop.f32.mrf.mxu2  ;;  %v620_v33 = vpop.f32.mrf.mxu3 }
 0x14e   :  { %v626_v61 = vadd.f32 %v607_v32, %v212_v24  ;;  %v627_v31 = vadd.f32 %v620_v33, %v213_v53  ;;  %v583_v37 = vpop.f32.mrf.mxu0  ;;  %v596_v38 = vpop.f32.mrf.mxu1 }
 0x150   :  { %v630_v40 = vmul.f32 0.5, %v626_v61  ;;  %1540 = vtanh.f32 %v627_v31 }
 0x151   :  { %v1537_v42 = vpop.eup %1536 }
 0x152   :  { %v1539_v52 = vpop.eup %1538  ;;  %v634_v54 = vmul.f32 0.5, %v1537_v42  ;;  %1542 = vtanh.f32 %v630_v40 }
 0x153   :  { %v635_v55 = vmul.f32 0.5, %v1539_v52 }
 0x154   :  { %v637_v2 = vadd.f32 0.5, %v634_v54 }
 0x155   :  { %v638_v3 = vadd.f32 0.5, %v635_v55  ;;  %v609_v6 = vpop.f32.mrf.mxu2  ;;  %v622_v7 = vpop.f32.mrf.mxu3 }
 0x156   :  { %v1541_v16 = vpop.eup %1540  ;;  %v108_v7 = vmul.f32 %v1930_v62, %v63_v25 }
 0x157   :  { %v641_v23 = vmul.f32 %v638_v3, %v1955_v43  ;;  %v642_v24 = vmul.f32 %v1541_v16, %v637_v2  ;;  %v143_v2 = vpop.permute.xlu2 %142  ;;  %v107_v3 = vmul.f32 %v1926_v56, %v63_v25 }
 0x158   :  { %v1543_v53 = vpop.eup %1542  ;;  %v182_v6 = vmul.f32 %v1928_v58, %v143_v2  ;;  %v183_v16 = vmul.f32 %v1932_v63, %v143_v2 }
 0x159   :  { %v2007_v32 = vadd.f32 %v642_v24, %v641_v23  ;;  %v636_v33 = vmul.f32 0.5, %v1543_v53 }
 0x15a   :  { %v214_v23 = vadd.f32 %v182_v6, %v107_v3  ;;  %v215_v24 = vadd.f32 %v183_v16, %v108_v7 }
 0x15b   :  { %1544 = vtanh.f32 %v2007_v32  ;;  %v639_v61 = vadd.f32 0.5, %v636_v33 }
 0x161   :  { %v1545_v31 = vpop.eup %1544 }
 0x162   :  { %v645_v37 = vmul.f32 %v1545_v31, %v639_v61 }
 0x164   :  { %v647_v38 = vrot.slane %v645_v37, 1  ;;  %v648_v40 = vrot.slane %v645_v37, 2  ;;  %v649_v42 = vrot.slane %v645_v37, 3  ;;  %661 = vst [vmem:[#allocation8 + $0x1] sm:$0x1] %v645_v37  ;;  %v650_v52 = vrot.slane %v645_v37, 4 }
 0x165   :  { %v674_v54 = vpack.c.bf16 %v645_v37, %v645_v37  ;;  %v651_v5 = vrot.slane %v645_v37, 5  ;;  %v652_v43 = vrot.slane %v645_v37, 6  ;;  %v653_v55 = vrot.slane %v645_v37, 7 }
 0x166   :  { %662 = vst [vmem:[#allocation8 + $0x9] sm:$0x1] %v647_v38  ;;  %v109_v37 = vmul.f32 %v1941_v14, %v63_v25  ;;  %v184_v38 = vmul.f32 %v1943_v15, %v143_v2 }
 0x167   :  { %663 = vst [vmem:[#allocation8 + $0x11] sm:$0x1] %v648_v40  ;;  %683 = vmatmul.bf16.vlgmr.msra.gmra.mxu0 %v674_v54  ;;  %696 = vmatmul.bf16.vlgmr.msra.gmra.mxu1 %v674_v54  ;;  %v110_v40 = vmul.f32 %v1945_v20, %v63_v25 }
 0x168   :  { %664 = vst [vmem:[#allocation8 + $0x19] sm:$0x1] %v649_v42  ;;  %709 = vmatmul.bf16.vlgmr.msra.gmra.mxu2 %v674_v54  ;;  %722 = vmatmul.bf16.vlgmr.msra.gmra.mxu3 %v674_v54  ;;  %v185_v42 = vmul.f32 %v1947_v21, %v143_v2 }
 0x169   :  { %665 = vst [vmem:[#allocation8 + $0x21] sm:$0x1] %v650_v52  ;;  %881 = vmatpush.bf16.msra.mxu0 %v1755_v4  ;;  %894 = vmatpush.bf16.msra.mxu1 %v1757_v8 }
 0x16a   :  { %666 = vst [vmem:[#allocation8 + $0x29] sm:$0x1] %v651_v5  ;;  %907 = vmatpush.bf16.msra.mxu2 %v1759_v9  ;;  %920 = vmatpush.bf16.msra.mxu3 %v1762_v13  ;;  %v216_v5 = vadd.f32 %v184_v38, %v109_v37 }
 0x16b   :  { %667 = vst [vmem:[#allocation8 + $0x31] sm:$0x1] %v652_v43  ;;  %v217_v43 = vadd.f32 %v185_v42, %v110_v40 }
 0x16c   :  { %668 = vst [vmem:[#allocation8 + $0x39] sm:$0x1] %v653_v55 }
 0x16d   :  { %882 = vmatpush.bf16.msra.mxu0 %v1766_v17  ;;  %895 = vmatpush.bf16.msra.mxu1 %v1768_v18 }
 0x16e   :  { %908 = vmatpush.bf16.msra.mxu2 %v1771_v22  ;;  %921 = vmatpush.bf16.msra.mxu3 %v1773_v26 }
 0x171   :  { %883 = vmatpush.bf16.msra.mxu0 %v1776_v30  ;;  %896 = vmatpush.bf16.msra.mxu1 %v1780_v34 }
 0x172   :  { %909 = vmatpush.bf16.msra.mxu2 %v1782_v35  ;;  %922 = vmatpush.bf16.msra.mxu3 %v1785_v39 }
 0x175   :  { %884 = vmatpush.bf16.msra.mxu0 %v1788_v45  ;;  %897 = vmatpush.bf16.msra.mxu1 %v1792_v46 }
 0x176   :  { %910 = vmatpush.bf16.msra.mxu2 %v1794_v47  ;;  %923 = vmatpush.bf16.msra.mxu3 %v1797_v51 }
 0x179   :  { %885 = vmatpush.bf16.msra.mxu0 %v1800_v57  ;;  %898 = vmatpush.bf16.msra.mxu1 %v1804_v59 }
 0x17a   :  { %911 = vmatpush.bf16.msra.mxu2 %v1806_v60  ;;  %924 = vmatpush.bf16.msra.mxu3 %v1812_v1 }
 0x17d   :  { %886 = vmatpush.bf16.msra.mxu0 %v1815_v10  ;;  %899 = vmatpush.bf16.msra.mxu1 %v1819_v11 }
 0x17e   :  { %912 = vmatpush.bf16.msra.mxu2 %v1821_v12  ;;  %925 = vmatpush.bf16.msra.mxu3 %v1824_v19 }
 0x181   :  { %887 = vmatpush.bf16.msra.mxu0 %v1827_v27  ;;  %900 = vmatpush.bf16.msra.mxu1 %v1831_v28 }
 0x182   :  { %913 = vmatpush.bf16.msra.mxu2 %v1833_v29  ;;  %926 = vmatpush.bf16.msra.mxu3 %v1836_v36 }
 0x185   :  { %888 = vmatpush.bf16.msra.mxu0 %v1840_v44  ;;  %901 = vmatpush.bf16.msra.mxu1 %v1844_v48 }
 0x186   :  { %914 = vmatpush.bf16.msra.mxu2 %v1846_v49  ;;  %927 = vmatpush.bf16.msra.mxu3 %v1849_v50 }
 0x1e4   :  { %v684_v53 = vpop.f32.mrf.mxu0  ;;  %v697_v33 = vpop.f32.mrf.mxu1 }
 0x1e5   :  { %v727_v61 = vadd.f32 %v684_v53, %v214_v23  ;;  %v728_v31 = vadd.f32 %v697_v33, %v215_v24 }
 0x1e7   :  { %v731_v52 = vmul.f32 0.5, %v727_v61  ;;  %v732_v54 = vmul.f32 0.5, %v728_v31 }
 0x1e9   :  { %1546 = vtanh.f32 %v731_v52 }
 0x1ea   :  { %1548 = vtanh.f32 %v732_v54 }
 0x1eb   :  { %v710_v55 = vpop.f32.mrf.mxu2  ;;  %v723_v3 = vpop.f32.mrf.mxu3 }
 0x1ec   :  { %v729_v6 = vadd.f32 %v710_v55, %v216_v5  ;;  %v730_v7 = vadd.f32 %v723_v3, %v217_v43  ;;  %v686_v16 = vpop.f32.mrf.mxu0  ;;  %v699_v23 = vpop.f32.mrf.mxu1 }
 0x1ee   :  { %v733_v24 = vmul.f32 0.5, %v729_v6  ;;  %1550 = vtanh.f32 %v730_v7 }
 0x1ef   :  { %v1547_v53 = vpop.eup %1546 }
 0x1f0   :  { %v1549_v33 = vpop.eup %1548  ;;  %v737_v0 = vmul.f32 0.5, %v1547_v53  ;;  %1552 = vtanh.f32 %v733_v24 }
 0x1f1   :  { %v738_v25 = vmul.f32 0.5, %v1549_v33  ;;  %v147_v33 = vpop.permute.xlu2 %146 }
 0x1f2   :  { %v740_v2 = vadd.f32 0.5, %v737_v0 }
 0x1f3   :  { %v741_v61 = vadd.f32 0.5, %v738_v25  ;;  %v712_v31 = vpop.f32.mrf.mxu2  ;;  %v725_v52 = vpop.f32.mrf.mxu3 }
 0x1f4   :  { %v1551_v54 = vpop.eup %1550  ;;  %v68_v25 = vpop.permute.xlu1 %67  ;;  %v187_v52 = vmul.f32 %v1932_v63, %v147_v33 }
 0x1f5   :  { %v744_v37 = vmul.f32 %v741_v61, %v2007_v32  ;;  %v745_v38 = vmul.f32 %v1551_v54, %v740_v2  ;;  %v111_v2 = vmul.f32 %v1926_v56, %v68_v25  ;;  %v186_v61 = vmul.f32 %v1928_v58, %v147_v33 }
 0x1f6   :  { %v1553_v40 = vpop.eup %1552  ;;  %v112_v31 = vmul.f32 %v1930_v62, %v68_v25 }
 0x1f7   :  { %v2052_v42 = vadd.f32 %v745_v38, %v744_v37  ;;  %v739_v5 = vmul.f32 0.5, %v1553_v40  ;;  %v218_v54 = vadd.f32 %v186_v61, %v111_v2 }
 0x1f8   :  { %v219_v37 = vadd.f32 %v187_v52, %v112_v31 }
 0x1f9   :  { %1554 = vtanh.f32 %v2052_v42  ;;  %v742_v43 = vadd.f32 0.5, %v739_v5 }
 0x1ff   :  { %v1555_v55 = vpop.eup %1554 }
 0x200   :  { %v748_v3 = vmul.f32 %v1555_v55, %v742_v43  ;;  %v113_v55 = vmul.f32 %v1941_v14, %v68_v25 }
 0x202   :  { %v750_v6 = vrot.slane %v748_v3, 1  ;;  %v751_v7 = vrot.slane %v748_v3, 2  ;;  %v752_v16 = vrot.slane %v748_v3, 3  ;;  %764 = vst [vmem:[#allocation8 + $0x2] sm:$0x1] %v748_v3  ;;  %v753_v0 = vrot.slane %v748_v3, 4 }
 0x203   :  { %v777_v23 = vpack.c.bf16 %v748_v3, %v748_v3  ;;  %v754_v24 = vrot.slane %v748_v3, 5  ;;  %v755_v53 = vrot.slane %v748_v3, 6  ;;  %v756_v32 = vrot.slane %v748_v3, 7 }
 0x204   :  { %765 = vst [vmem:[#allocation8 + $0xa] sm:$0x1] %v750_v6  ;;  %v188_v3 = vmul.f32 %v1943_v15, %v147_v33  ;;  %v114_v6 = vmul.f32 %v1945_v20, %v68_v25 }
 0x205   :  { %766 = vst [vmem:[#allocation8 + $0x12] sm:$0x1] %v751_v7  ;;  %786 = vmatmul.bf16.vlgmr.msrb.gmra.mxu0 %v777_v23  ;;  %799 = vmatmul.bf16.vlgmr.msrb.gmra.mxu1 %v777_v23  ;;  %v189_v7 = vmul.f32 %v1947_v21, %v147_v33 }
 0x206   :  { %767 = vst [vmem:[#allocation8 + $0x1a] sm:$0x1] %v752_v16  ;;  %812 = vmatmul.bf16.vlgmr.msrb.gmra.mxu2 %v777_v23  ;;  %825 = vmatmul.bf16.vlgmr.msrb.gmra.mxu3 %v777_v23  ;;  %v45_v23 = vld [vmem:[%s2232_s0 + $0x20] sm:$0xff] }
 0x207   :  { %768 = vst [vmem:[#allocation8 + $0x22] sm:$0x1] %v753_v0  ;;  %984 = vmatpush.bf16.msrb.mxu0 %v1755_v4  ;;  %997 = vmatpush.bf16.msrb.mxu1 %v1757_v8 }
 0x208   :  { %769 = vst [vmem:[#allocation8 + $0x2a] sm:$0x1] %v754_v24  ;;  %1010 = vmatpush.bf16.msrb.mxu2 %v1759_v9  ;;  %1023 = vmatpush.bf16.msrb.mxu3 %v1762_v13  ;;  %v220_v24 = vadd.f32 %v188_v3, %v113_v55 }
 0x209   :  { %770 = vst [vmem:[#allocation8 + $0x32] sm:$0x1] %v755_v53  ;;  %150 = vperm.xlu1 %1521, %v45_v23   ;;  %72 = vperm.xlu0 %1520, %v45_v23   ;;  %v221_v53 = vadd.f32 %v189_v7, %v114_v6 }
 0x20a   :  { %771 = vst [vmem:[#allocation8 + $0x3a] sm:$0x1] %v756_v32  ;;  %v46_v32 = vld [vmem:[%s2232_s0 + $0x28] sm:$0xff] }
 0x20b   :  { %985 = vmatpush.bf16.msrb.mxu0 %v1766_v17  ;;  %998 = vmatpush.bf16.msrb.mxu1 %v1768_v18 }
 0x20c   :  { %1011 = vmatpush.bf16.msrb.mxu2 %v1771_v22  ;;  %1024 = vmatpush.bf16.msrb.mxu3 %v1773_v26 }
 0x20d   :  { %77 = vperm.xlu2 %1522, %v46_v32  }
 0x20f   :  { %986 = vmatpush.bf16.msrb.mxu0 %v1776_v30  ;;  %999 = vmatpush.bf16.msrb.mxu1 %v1780_v34 }
 0x210   :  { %1012 = vmatpush.bf16.msrb.mxu2 %v1782_v35  ;;  %1025 = vmatpush.bf16.msrb.mxu3 %v1785_v39 }
 0x211   :  { %154 = vperm.xlu1 %1521, %v46_v32   ;;  %1523 = vset.pattern.permute.xlu0 %v1712_v41 }
 0x213   :  { %987 = vmatpush.bf16.msrb.mxu0 %v1788_v45  ;;  %1000 = vmatpush.bf16.msrb.mxu1 %v1792_v46 }
 0x214   :  { %1013 = vmatpush.bf16.msrb.mxu2 %v1794_v47  ;;  %1026 = vmatpush.bf16.msrb.mxu3 %v1797_v51 }
 0x217   :  { %988 = vmatpush.bf16.msrb.mxu0 %v1800_v57  ;;  %1001 = vmatpush.bf16.msrb.mxu1 %v1804_v59 }
 0x218   :  { %1014 = vmatpush.bf16.msrb.mxu2 %v1806_v60  ;;  %1027 = vmatpush.bf16.msrb.mxu3 %v1812_v1 }
 0x21b   :  { %989 = vmatpush.bf16.msrb.mxu0 %v1815_v10  ;;  %1002 = vmatpush.bf16.msrb.mxu1 %v1819_v11 }
 0x21c   :  { %1015 = vmatpush.bf16.msrb.mxu2 %v1821_v12  ;;  %1028 = vmatpush.bf16.msrb.mxu3 %v1824_v19 }
 0x21f   :  { %990 = vmatpush.bf16.msrb.mxu0 %v1827_v27  ;;  %1003 = vmatpush.bf16.msrb.mxu1 %v1831_v28 }
 0x220   :  { %1016 = vmatpush.bf16.msrb.mxu2 %v1833_v29  ;;  %1029 = vmatpush.bf16.msrb.mxu3 %v1836_v36 }
 0x223   :  { %991 = vmatpush.bf16.msrb.mxu0 %v1840_v44  ;;  %1004 = vmatpush.bf16.msrb.mxu1 %v1844_v48 }
 0x224   :  { %1017 = vmatpush.bf16.msrb.mxu2 %v1846_v49  ;;  %1030 = vmatpush.bf16.msrb.mxu3 %v1849_v50 }
 0x282   :  { %v787_v38 = vpop.f32.mrf.mxu0  ;;  %v800_v40 = vpop.f32.mrf.mxu1 }
 0x283   :  { %v830_v5 = vadd.f32 %v787_v38, %v218_v54  ;;  %v831_v43 = vadd.f32 %v800_v40, %v219_v37 }
 0x285   :  { %v834_v16 = vmul.f32 0.5, %v830_v5  ;;  %v835_v0 = vmul.f32 0.5, %v831_v43 }
 0x287   :  { %1556 = vtanh.f32 %v834_v16 }
 0x288   :  { %1558 = vtanh.f32 %v835_v0 }
 0x289   :  { %v813_v2 = vpop.f32.mrf.mxu2  ;;  %v826_v25 = vpop.f32.mrf.mxu3 }
 0x28a   :  { %v832_v33 = vadd.f32 %v813_v2, %v220_v24  ;;  %v833_v61 = vadd.f32 %v826_v25, %v221_v53  ;;  %v789_v31 = vpop.f32.mrf.mxu0  ;;  %v802_v52 = vpop.f32.mrf.mxu1  ;;  %v2239_v53 = vmov 0  }
 0x28b   :  { %1524 = vset.pattern.permute.xlu1 %v2239_v53 }
 0x28c   :  { %v836_v54 = vmul.f32 0.5, %v832_v33  ;;  %1560 = vtanh.f32 %v833_v61 }
 0x28d   :  { %v1557_v37 = vpop.eup %1556 }
 0x28e   :  { %v1559_v38 = vpop.eup %1558  ;;  %v840_v40 = vmul.f32 0.5, %v1557_v37  ;;  %1562 = vtanh.f32 %v836_v54 }
 0x28f   :  { %v841_v5 = vmul.f32 0.5, %v1559_v38 }
 0x290   :  { %v843_v43 = vadd.f32 0.5, %v840_v40 }
 0x291   :  { %v844_v55 = vadd.f32 0.5, %v841_v5  ;;  %v815_v3 = vpop.f32.mrf.mxu2  ;;  %v828_v6 = vpop.f32.mrf.mxu3 }
 0x292   :  { %v1561_v7 = vpop.eup %1560  ;;  %v73_v5 = vpop.permute.xlu0 %72 }
 0x293   :  { %v847_v16 = vmul.f32 %v844_v55, %v2052_v42  ;;  %v848_v0 = vmul.f32 %v1561_v7, %v843_v43  ;;  %v151_v43 = vpop.permute.xlu1 %150  ;;  %v115_v55 = vmul.f32 %v1926_v56, %v73_v5  ;;  %v116_v6 = vmul.f32 %v1930_v62, %v73_v5 }
 0x294   :  { %v1563_v23 = vpop.eup %1562  ;;  %v190_v3 = vmul.f32 %v1928_v58, %v151_v43  ;;  %v191_v7 = vmul.f32 %v1932_v63, %v151_v43 }
 0x295   :  { %v2103_v24 = vadd.f32 %v848_v0, %v847_v16  ;;  %v842_v2 = vmul.f32 0.5, %v1563_v23 }
 0x296   :  { %v222_v16 = vadd.f32 %v190_v3, %v115_v55  ;;  %v223_v0 = vadd.f32 %v191_v7, %v116_v6 }
 0x297   :  { %1564 = vtanh.f32 %v2103_v24  ;;  %v845_v25 = vadd.f32 0.5, %v842_v2 }
 0x29d   :  { %v1565_v32 = vpop.eup %1564 }
 0x29e   :  { %v851_v33 = vmul.f32 %v1565_v32, %v845_v25  ;;  %v117_v32 = vmul.f32 %v1941_v14, %v73_v5 }
 0x2a0   :  { %v853_v61 = vrot.slane %v851_v33, 1  ;;  %v854_v31 = vrot.slane %v851_v33, 2  ;;  %v855_v52 = vrot.slane %v851_v33, 3  ;;  %867 = vst [vmem:[#allocation8 + $0x3] sm:$0x1] %v851_v33  ;;  %v856_v54 = vrot.slane %v851_v33, 4 }
 0x2a1   :  { %v880_v37 = vpack.c.bf16 %v851_v33, %v851_v33  ;;  %v857_v38 = vrot.slane %v851_v33, 5  ;;  %v858_v42 = vrot.slane %v851_v33, 6  ;;  %v859_v40 = vrot.slane %v851_v33, 7 }
 0x2a2   :  { %868 = vst [vmem:[#allocation8 + $0xb] sm:$0x1] %v853_v61  ;;  %v192_v33 = vmul.f32 %v1943_v15, %v151_v43  ;;  %v118_v61 = vmul.f32 %v1945_v20, %v73_v5 }
 0x2a3   :  { %869 = vst [vmem:[#allocation8 + $0x13] sm:$0x1] %v854_v31  ;;  %889 = vmatmul.bf16.vlgmr.msra.gmra.mxu0 %v880_v37  ;;  %902 = vmatmul.bf16.vlgmr.msra.gmra.mxu1 %v880_v37  ;;  %v193_v31 = vmul.f32 %v1947_v21, %v151_v43 }
 0x2a4   :  { %870 = vst [vmem:[#allocation8 + $0x1b] sm:$0x1] %v855_v52  ;;  %915 = vmatmul.bf16.vlgmr.msra.gmra.mxu2 %v880_v37  ;;  %928 = vmatmul.bf16.vlgmr.msra.gmra.mxu3 %v880_v37  ;;  %v224_v37 = vadd.f32 %v192_v33, %v117_v32 }
 0x2a5   :  { %871 = vst [vmem:[#allocation8 + $0x23] sm:$0x1] %v856_v54  ;;  %1087 = vmatpush.bf16.msra.mxu0 %v1755_v4  ;;  %1100 = vmatpush.bf16.msra.mxu1 %v1757_v8 }
 0x2a6   :  { %872 = vst [vmem:[#allocation8 + $0x2b] sm:$0x1] %v857_v38  ;;  %1113 = vmatpush.bf16.msra.mxu2 %v1759_v9  ;;  %1126 = vmatpush.bf16.msra.mxu3 %v1762_v13  ;;  %v225_v38 = vadd.f32 %v193_v31, %v118_v61 }
 0x2a7   :  { %873 = vst [vmem:[#allocation8 + $0x33] sm:$0x1] %v858_v42  ;;  %v47_v42 = vld [vmem:[%s2232_s0 + $0x30] sm:$0xff] }
 0x2a8   :  { %874 = vst [vmem:[#allocation8 + $0x3b] sm:$0x1] %v859_v40  ;;  %158 = vperm.xlu0 %1523, %v47_v42   ;;  %82 = vperm.xlu2 %1522, %v47_v42  }
 0x2a9   :  { %1088 = vmatpush.bf16.msra.mxu0 %v1766_v17  ;;  %1101 = vmatpush.bf16.msra.mxu1 %v1768_v18 }
 0x2aa   :  { %1114 = vmatpush.bf16.msra.mxu2 %v1771_v22  ;;  %1127 = vmatpush.bf16.msra.mxu3 %v1773_v26 }
 0x2ad   :  { %1089 = vmatpush.bf16.msra.mxu0 %v1776_v30  ;;  %1102 = vmatpush.bf16.msra.mxu1 %v1780_v34 }
 0x2ae   :  { %1115 = vmatpush.bf16.msra.mxu2 %v1782_v35  ;;  %1128 = vmatpush.bf16.msra.mxu3 %v1785_v39 }
 0x2b0   :  { %1525 = vset.pattern.permute.xlu2 %v1712_v41 }
 0x2b1   :  { %1090 = vmatpush.bf16.msra.mxu0 %v1788_v45  ;;  %1103 = vmatpush.bf16.msra.mxu1 %v1792_v46 }
 0x2b2   :  { %1116 = vmatpush.bf16.msra.mxu2 %v1794_v47  ;;  %1129 = vmatpush.bf16.msra.mxu3 %v1797_v51 }
 0x2b5   :  { %1091 = vmatpush.bf16.msra.mxu0 %v1800_v57  ;;  %1104 = vmatpush.bf16.msra.mxu1 %v1804_v59 }
 0x2b6   :  { %1117 = vmatpush.bf16.msra.mxu2 %v1806_v60  ;;  %1130 = vmatpush.bf16.msra.mxu3 %v1812_v1 }
 0x2b9   :  { %1092 = vmatpush.bf16.msra.mxu0 %v1815_v10  ;;  %1105 = vmatpush.bf16.msra.mxu1 %v1819_v11 }
 0x2ba   :  { %1118 = vmatpush.bf16.msra.mxu2 %v1821_v12  ;;  %1131 = vmatpush.bf16.msra.mxu3 %v1824_v19 }
 0x2bd   :  { %1093 = vmatpush.bf16.msra.mxu0 %v1827_v27  ;;  %1106 = vmatpush.bf16.msra.mxu1 %v1831_v28 }
 0x2be   :  { %1119 = vmatpush.bf16.msra.mxu2 %v1833_v29  ;;  %1132 = vmatpush.bf16.msra.mxu3 %v1836_v36 }
 0x2c1   :  { %1094 = vmatpush.bf16.msra.mxu0 %v1840_v44  ;;  %1107 = vmatpush.bf16.msra.mxu1 %v1844_v48 }
 0x2c2   :  { %1120 = vmatpush.bf16.msra.mxu2 %v1846_v49  ;;  %1133 = vmatpush.bf16.msra.mxu3 %v1849_v50 }
 0x320   :  { %v890_v23 = vpop.f32.mrf.mxu0  ;;  %v903_v53 = vpop.f32.mrf.mxu1 }
 0x321   :  { %v933_v2 = vadd.f32 %v890_v23, %v222_v16  ;;  %v934_v25 = vadd.f32 %v903_v53, %v223_v0 }
 0x323   :  { %v937_v52 = vmul.f32 0.5, %v933_v2  ;;  %v938_v54 = vmul.f32 0.5, %v934_v25 }
 0x325   :  { %1566 = vtanh.f32 %v937_v52 }
 0x326   :  { %1568 = vtanh.f32 %v938_v54 }
 0x327   :  { %v916_v40 = vpop.f32.mrf.mxu2  ;;  %v929_v55 = vpop.f32.mrf.mxu3 }
 0x328   :  { %v935_v3 = vadd.f32 %v916_v40, %v224_v37  ;;  %v936_v6 = vadd.f32 %v929_v55, %v225_v38  ;;  %v892_v7 = vpop.f32.mrf.mxu0  ;;  %v905_v5 = vpop.f32.mrf.mxu1 }
 0x32a   :  { %v939_v16 = vmul.f32 0.5, %v935_v3  ;;  %1570 = vtanh.f32 %v936_v6 }
 0x32b   :  { %v1567_v43 = vpop.eup %1566 }
 0x32c   :  { %v1569_v0 = vpop.eup %1568  ;;  %v943_v23 = vmul.f32 0.5, %v1567_v43  ;;  %1572 = vtanh.f32 %v939_v16 }
 0x32d   :  { %v944_v53 = vmul.f32 0.5, %v1569_v0 }
 0x32e   :  { %v946_v2 = vadd.f32 0.5, %v943_v23 }
 0x32f   :  { %v947_v25 = vadd.f32 0.5, %v944_v53  ;;  %v918_v32 = vpop.f32.mrf.mxu2  ;;  %v931_v33 = vpop.f32.mrf.mxu3 }
 0x330   :  { %v1571_v61 = vpop.eup %1570 }
 0x331   :  { %v950_v31 = vmul.f32 %v947_v25, %v2103_v24  ;;  %v951_v52 = vmul.f32 %v1571_v61, %v946_v2 }
 0x332   :  { %v1573_v54 = vpop.eup %1572 }
 0x333   :  { %v2152_v37 = vadd.f32 %v951_v52, %v950_v31  ;;  %v945_v38 = vmul.f32 0.5, %v1573_v54 }
 0x335   :  { %1574 = vtanh.f32 %v2152_v37  ;;  %v948_v42 = vadd.f32 0.5, %v945_v38 }
 0x33b   :  { %v1575_v40 = vpop.eup %1574 }
 0x33c   :  { %v954_v55 = vmul.f32 %v1575_v40, %v948_v42 }
 0x33e   :  { %v956_v3 = vrot.slane %v954_v55, 1  ;;  %v957_v6 = vrot.slane %v954_v55, 2  ;;  %v958_v7 = vrot.slane %v954_v55, 3  ;;  %970 = vst [vmem:[#allocation8 + $0x4] sm:$0x1] %v954_v55  ;;  %v959_v5 = vrot.slane %v954_v55, 4 }
 0x33f   :  { %v983_v16 = vpack.c.bf16 %v954_v55, %v954_v55  ;;  %v960_v41 = vrot.slane %v954_v55, 5  ;;  %v961_v43 = vrot.slane %v954_v55, 6  ;;  %v962_v24 = vrot.slane %v954_v55, 7 }
 0x340   :  { %971 = vst [vmem:[#allocation8 + $0xc] sm:$0x1] %v956_v3 }
 0x341   :  { %972 = vst [vmem:[#allocation8 + $0x14] sm:$0x1] %v957_v6  ;;  %992 = vmatmul.bf16.vlgmr.msrb.gmra.mxu0 %v983_v16  ;;  %1005 = vmatmul.bf16.vlgmr.msrb.gmra.mxu1 %v983_v16 }
 0x342   :  { %973 = vst [vmem:[#allocation8 + $0x1c] sm:$0x1] %v958_v7  ;;  %1018 = vmatmul.bf16.vlgmr.msrb.gmra.mxu2 %v983_v16  ;;  %1031 = vmatmul.bf16.vlgmr.msrb.gmra.mxu3 %v983_v16 }
 0x343   :  { %974 = vst [vmem:[#allocation8 + $0x24] sm:$0x1] %v959_v5  ;;  %1190 = vmatpush.bf16.msrb.mxu0 %v1755_v4  ;;  %1203 = vmatpush.bf16.msrb.mxu1 %v1757_v8  ;;  %v78_v4 = vpop.permute.xlu2 %77  ;;  %v155_v8 = vpop.permute.xlu1 %154 }
 0x344   :  { %975 = vst [vmem:[#allocation8 + $0x2c] sm:$0x1] %v960_v41  ;;  %1216 = vmatpush.bf16.msrb.mxu2 %v1759_v9  ;;  %1229 = vmatpush.bf16.msrb.mxu3 %v1762_v13  ;;  %v119_v9 = vmul.f32 %v1926_v56, %v78_v4  ;;  %v194_v13 = vmul.f32 %v1928_v58, %v155_v8  ;;  %v159_v41 = vpop.permute.xlu0 %158 }
 0x345   :  { %976 = vst [vmem:[#allocation8 + $0x34] sm:$0x1] %v961_v43  ;;  %v198_v43 = vmul.f32 %v1928_v58, %v159_v41 }
 0x346   :  { %977 = vst [vmem:[#allocation8 + $0x3c] sm:$0x1] %v962_v24  ;;  %v199_v24 = vmul.f32 %v1932_v63, %v159_v41 }
 0x347   :  { %1191 = vmatpush.bf16.msrb.mxu0 %v1766_v17  ;;  %1204 = vmatpush.bf16.msrb.mxu1 %v1768_v18  ;;  %v120_v17 = vmul.f32 %v1930_v62, %v78_v4  ;;  %v195_v18 = vmul.f32 %v1932_v63, %v155_v8 }
 0x348   :  { %1217 = vmatpush.bf16.msrb.mxu2 %v1771_v22  ;;  %1230 = vmatpush.bf16.msrb.mxu3 %v1773_v26  ;;  %v226_v22 = vadd.f32 %v194_v13, %v119_v9 }
 0x349   :  { %v227_v26 = vadd.f32 %v195_v18, %v120_v17 }
 0x34b   :  { %1192 = vmatpush.bf16.msrb.mxu0 %v1776_v30  ;;  %1205 = vmatpush.bf16.msrb.mxu1 %v1780_v34  ;;  %v83_v16 = vpop.permute.xlu2 %82 }
 0x34c   :  { %1218 = vmatpush.bf16.msrb.mxu2 %v1782_v35  ;;  %1231 = vmatpush.bf16.msrb.mxu3 %v1785_v39 }
 0x34f   :  { %1193 = vmatpush.bf16.msrb.mxu0 %v1788_v45  ;;  %1206 = vmatpush.bf16.msrb.mxu1 %v1792_v46  ;;  %v121_v45 = vmul.f32 %v1941_v14, %v78_v4  ;;  %v196_v46 = vmul.f32 %v1943_v15, %v155_v8 }
 0x350   :  { %1219 = vmatpush.bf16.msrb.mxu2 %v1794_v47  ;;  %1232 = vmatpush.bf16.msrb.mxu3 %v1797_v51  ;;  %v122_v47 = vmul.f32 %v1945_v20, %v78_v4  ;;  %v197_v51 = vmul.f32 %v1947_v21, %v155_v8  ;;  %v123_v4 = vmul.f32 %v1926_v56, %v83_v16 }
 0x351   :  { %v124_v8 = vmul.f32 %v1930_v62, %v83_v16 }
 0x352   :  { %v230_v9 = vadd.f32 %v198_v43, %v123_v4 }
 0x353   :  { %1194 = vmatpush.bf16.msrb.mxu0 %v1800_v57  ;;  %1207 = vmatpush.bf16.msrb.mxu1 %v1804_v59  ;;  %v231_v13 = vadd.f32 %v199_v24, %v124_v8 }
 0x354   :  { %1220 = vmatpush.bf16.msrb.mxu2 %v1806_v60  ;;  %1233 = vmatpush.bf16.msrb.mxu3 %v1812_v1  ;;  %v228_v60 = vadd.f32 %v196_v46, %v121_v45  ;;  %v229_v1 = vadd.f32 %v197_v51, %v122_v47 }
 0x357   :  { %1195 = vmatpush.bf16.msrb.mxu0 %v1815_v10  ;;  %1208 = vmatpush.bf16.msrb.mxu1 %v1819_v11 }
 0x358   :  { %1221 = vmatpush.bf16.msrb.mxu2 %v1821_v12  ;;  %1234 = vmatpush.bf16.msrb.mxu3 %v1824_v19 }
 0x35b   :  { %1196 = vmatpush.bf16.msrb.mxu0 %v1827_v27  ;;  %1209 = vmatpush.bf16.msrb.mxu1 %v1831_v28 }
 0x35c   :  { %1222 = vmatpush.bf16.msrb.mxu2 %v1833_v29  ;;  %1235 = vmatpush.bf16.msrb.mxu3 %v1836_v36 }
 0x35f   :  { %1197 = vmatpush.bf16.msrb.mxu0 %v1840_v44  ;;  %1210 = vmatpush.bf16.msrb.mxu1 %v1844_v48 }
 0x360   :  { %1223 = vmatpush.bf16.msrb.mxu2 %v1846_v49  ;;  %1236 = vmatpush.bf16.msrb.mxu3 %v1849_v50 }
 0x3be   :  { %v993_v30 = vpop.f32.mrf.mxu0  ;;  %v1006_v34 = vpop.f32.mrf.mxu1 }
 0x3bf   :  { %v1036_v35 = vadd.f32 %v993_v30, %v226_v22  ;;  %v1037_v39 = vadd.f32 %v1006_v34, %v227_v26  ;;  %v200_v30 = vmul.f32 %v1943_v15, %v159_v41  ;;  %v201_v34 = vmul.f32 %v1947_v21, %v159_v41 }
 0x3c1   :  { %v1040_v57 = vmul.f32 0.5, %v1036_v35  ;;  %v1041_v59 = vmul.f32 0.5, %v1037_v39  ;;  %v125_v35 = vmul.f32 %v1941_v14, %v83_v16  ;;  %v126_v39 = vmul.f32 %v1945_v20, %v83_v16 }
 0x3c3   :  { %1576 = vtanh.f32 %v1040_v57  ;;  %v232_v47 = vadd.f32 %v200_v30, %v125_v35  ;;  %v233_v51 = vadd.f32 %v201_v34, %v126_v39  ;;  %v48_v57 = vld [vmem:[%s2232_s0 + $0x38] sm:$0xff]  ;;  %s1714_s0 = smov [#allocation9]  }
 0x3c4   :  { %1578 = vtanh.f32 %v1041_v59  ;;  %87 = vperm.xlu1 %1524, %v48_v57   ;;  %162 = vperm.xlu2 %1525, %v48_v57   ;;  %s1309_s18 = sshll.u32 %s1714_s0, 4  ;;  %s1310_s18 = int_to_ptr.vmem [resolvable:$true] %s1309_s18 }
 0x3c5   :  { %v1019_v10 = vpop.f32.mrf.mxu2  ;;  %v1032_v11 = vpop.f32.mrf.mxu3 }
 0x3c6   :  { %v1038_v12 = vadd.f32 %v1019_v10, %v228_v60  ;;  %v1039_v19 = vadd.f32 %v1032_v11, %v229_v1  ;;  %v995_v27 = vpop.f32.mrf.mxu0  ;;  %v1008_v28 = vpop.f32.mrf.mxu1 }
 0x3c8   :  { %v1042_v29 = vmul.f32 0.5, %v1038_v12  ;;  %1580 = vtanh.f32 %v1039_v19 }
 0x3c9   :  { %v1577_v36 = vpop.eup %1576 }
 0x3ca   :  { %v1579_v44 = vpop.eup %1578  ;;  %v1046_v48 = vmul.f32 0.5, %v1577_v36  ;;  %1582 = vtanh.f32 %v1042_v29 }
 0x3cb   :  { %v1047_v49 = vmul.f32 0.5, %v1579_v44 }
 0x3cc   :  { %v1049_v50 = vadd.f32 0.5, %v1046_v48 }
 0x3cd   :  { %v1050_v0 = vadd.f32 0.5, %v1047_v49  ;;  %v1021_v23 = vpop.f32.mrf.mxu2  ;;  %v1034_v53 = vpop.f32.mrf.mxu3 }
 0x3ce   :  { %v1581_v2 = vpop.eup %1580 }
 0x3cf   :  { %v1053_v25 = vmul.f32 %v1050_v0, %v2152_v37  ;;  %v1054_v32 = vmul.f32 %v1581_v2, %v1049_v50 }
 0x3d0   :  { %v1583_v33 = vpop.eup %1582 }
 0x3d1   :  { %v2196_v61 = vadd.f32 %v1054_v32, %v1053_v25  ;;  %v1048_v31 = vmul.f32 0.5, %v1583_v33 }
 0x3d3   :  { %1584 = vtanh.f32 %v2196_v61  ;;  %v1051_v52 = vadd.f32 0.5, %v1048_v31 }
 0x3d9   :  { %v1585_v54 = vpop.eup %1584 }
 0x3da   :  { %v1057_v38 = vmul.f32 %v1585_v54, %v1051_v52 }
 0x3dc   :  { %v1059_v42 = vrot.slane %v1057_v38, 1  ;;  %v1060_v40 = vrot.slane %v1057_v38, 2  ;;  %v1061_v55 = vrot.slane %v1057_v38, 3  ;;  %1073 = vst [vmem:[#allocation8 + $0x5] sm:$0x1] %v1057_v38  ;;  %v1062_v3 = vrot.slane %v1057_v38, 4 }
 0x3dd   :  { %v1086_v6 = vpack.c.bf16 %v1057_v38, %v1057_v38  ;;  %v1063_v7 = vrot.slane %v1057_v38, 5  ;;  %v1064_v5 = vrot.slane %v1057_v38, 6  ;;  %v1065_v37 = vrot.slane %v1057_v38, 7 }
 0x3de   :  { %1074 = vst [vmem:[#allocation8 + $0xd] sm:$0x1] %v1059_v42 }
 0x3df   :  { %1075 = vst [vmem:[#allocation8 + $0x15] sm:$0x1] %v1060_v40  ;;  %1095 = vmatmul.bf16.vlgmr.msra.gmra.mxu0 %v1086_v6  ;;  %1108 = vmatmul.bf16.vlgmr.msra.gmra.mxu1 %v1086_v6 }
 0x3e0   :  { %1076 = vst [vmem:[#allocation8 + $0x1d] sm:$0x1] %v1061_v55  ;;  %1121 = vmatmul.bf16.vlgmr.msra.gmra.mxu2 %v1086_v6  ;;  %1134 = vmatmul.bf16.vlgmr.msra.gmra.mxu3 %v1086_v6 }
 0x3e1   :  { %1077 = vst [vmem:[#allocation8 + $0x25] sm:$0x1] %v1062_v3 }
 0x3e2   :  { %1078 = vst [vmem:[#allocation8 + $0x2d] sm:$0x1] %v1063_v7 }
 0x3e3   :  { %1079 = vst [vmem:[#allocation8 + $0x35] sm:$0x1] %v1064_v5 }
 0x3e4   :  { %1080 = vst [vmem:[#allocation8 + $0x3d] sm:$0x1] %v1065_v37 }
 0x41e   :  { %v163_v7 = vpop.permute.xlu2 %162 }
 0x41f   :  { %v202_v37 = vmul.f32 %v1928_v58, %v163_v7  ;;  %v203_v16 = vmul.f32 %v1932_v63, %v163_v7 }
 0x436   :  { %v88_v5 = vpop.permute.xlu1 %87 }
 0x437   :  { %v127_v41 = vmul.f32 %v1926_v56, %v88_v5  ;;  %v128_v43 = vmul.f32 %v1930_v62, %v88_v5  ;;  %v130_v58 = vmul.f32 %v1945_v20, %v88_v5 }
 0x439   :  { %v234_v24 = vadd.f32 %v202_v37, %v127_v41  ;;  %v235_v4 = vadd.f32 %v203_v16, %v128_v43 }
 0x45c   :  { %v1096_v17 = vpop.f32.mrf.mxu0  ;;  %v1109_v18 = vpop.f32.mrf.mxu1 }
 0x45d   :  { %v1139_v22 = vadd.f32 %v1096_v17, %v230_v9  ;;  %v1140_v26 = vadd.f32 %v1109_v18, %v231_v13  ;;  %v204_v18 = vmul.f32 %v1943_v15, %v163_v7 }
 0x45f   :  { %v1143_v45 = vmul.f32 0.5, %v1139_v22  ;;  %v1144_v46 = vmul.f32 0.5, %v1140_v26  ;;  %v205_v22 = vmul.f32 %v1947_v21, %v163_v7  ;;  %v129_v26 = vmul.f32 %v1941_v14, %v88_v5 }
 0x461   :  { %1586 = vtanh.f32 %v1143_v45  ;;  %v236_v56 = vadd.f32 %v204_v18, %v129_v26  ;;  %v237_v62 = vadd.f32 %v205_v22, %v130_v58 }
 0x462   :  { %1588 = vtanh.f32 %v1144_v46 }
 0x463   :  { %v1122_v59 = vpop.f32.mrf.mxu2  ;;  %v1135_v60 = vpop.f32.mrf.mxu3 }
 0x464   :  { %v1141_v1 = vadd.f32 %v1122_v59, %v232_v47  ;;  %v1142_v10 = vadd.f32 %v1135_v60, %v233_v51  ;;  %v1098_v11 = vpop.f32.mrf.mxu0  ;;  %v1111_v12 = vpop.f32.mrf.mxu1 }
 0x466   :  { %v1145_v19 = vmul.f32 0.5, %v1141_v1  ;;  %1590 = vtanh.f32 %v1142_v10 }
 0x467   :  { %v1587_v27 = vpop.eup %1586 }
 0x468   :  { %v1589_v28 = vpop.eup %1588  ;;  %v1149_v29 = vmul.f32 0.5, %v1587_v27  ;;  %1592 = vtanh.f32 %v1145_v19 }
 0x469   :  { %v1150_v36 = vmul.f32 0.5, %v1589_v28 }
 0x46a   :  { %v1152_v44 = vadd.f32 0.5, %v1149_v29 }
 0x46b   :  { %v1153_v48 = vadd.f32 0.5, %v1150_v36  ;;  %v1124_v49 = vpop.f32.mrf.mxu2  ;;  %v1137_v50 = vpop.f32.mrf.mxu3 }
 0x46c   :  { %v1591_v0 = vpop.eup %1590 }
 0x46d   :  { %v1156_v23 = vmul.f32 %v1153_v48, %v2196_v61  ;;  %v1157_v53 = vmul.f32 %v1591_v0, %v1152_v44 }
 0x46e   :  { %v1593_v2 = vpop.eup %1592 }
 0x46f   :  { %v2211_v25 = vadd.f32 %v1157_v53, %v1156_v23  ;;  %v1151_v32 = vmul.f32 0.5, %v1593_v2 }
 0x471   :  { %1594 = vtanh.f32 %v2211_v25  ;;  %v1154_v33 = vadd.f32 0.5, %v1151_v32 }
 0x477   :  { %v1595_v31 = vpop.eup %1594 }
 0x478   :  { %v1160_v52 = vmul.f32 %v1595_v31, %v1154_v33 }
 0x47a   :  { %v1162_v54 = vrot.slane %v1160_v52, 1  ;;  %v1163_v38 = vrot.slane %v1160_v52, 2  ;;  %v1164_v42 = vrot.slane %v1160_v52, 3  ;;  %1176 = vst [vmem:[#allocation8 + $0x6] sm:$0x1] %v1160_v52  ;;  %v1165_v40 = vrot.slane %v1160_v52, 4 }
 0x47b   :  { %v1189_v55 = vpack.c.bf16 %v1160_v52, %v1160_v52  ;;  %v1166_v3 = vrot.slane %v1160_v52, 5  ;;  %v1167_v6 = vrot.slane %v1160_v52, 6  ;;  %v1168_v61 = vrot.slane %v1160_v52, 7 }
 0x47c   :  { %1177 = vst [vmem:[#allocation8 + $0xe] sm:$0x1] %v1162_v54 }
 0x47d   :  { %1178 = vst [vmem:[#allocation8 + $0x16] sm:$0x1] %v1163_v38  ;;  %1198 = vmatmul.bf16.vlgmr.msrb.gmra.mxu0 %v1189_v55  ;;  %1211 = vmatmul.bf16.vlgmr.msrb.gmra.mxu1 %v1189_v55 }
 0x47e   :  { %1179 = vst [vmem:[#allocation8 + $0x1e] sm:$0x1] %v1164_v42  ;;  %1224 = vmatmul.bf16.vlgmr.msrb.gmra.mxu2 %v1189_v55  ;;  %1237 = vmatmul.bf16.vlgmr.msrb.gmra.mxu3 %v1189_v55 }
 0x47f   :  { %1180 = vst [vmem:[#allocation8 + $0x26] sm:$0x1] %v1165_v40 }
 0x480   :  { %1181 = vst [vmem:[#allocation8 + $0x2e] sm:$0x1] %v1166_v3 }
 0x481   :  { %1182 = vst [vmem:[#allocation8 + $0x36] sm:$0x1] %v1167_v6 }
 0x482   :  { %1183 = vst [vmem:[#allocation8 + $0x3e] sm:$0x1] %v1168_v61 }
 0x4fa   :  { %v1199_v8 = vpop.f32.mrf.mxu0  ;;  %v1212_v9 = vpop.f32.mrf.mxu1 }
 0x4fb   :  { %v1242_v13 = vadd.f32 %v1199_v8, %v234_v24  ;;  %v1243_v17 = vadd.f32 %v1212_v9, %v235_v4 }
 0x4fd   :  { %v1246_v30 = vmul.f32 0.5, %v1242_v13  ;;  %v1247_v63 = vmul.f32 0.5, %v1243_v17 }
 0x4ff   :  { %1596 = vtanh.f32 %v1246_v30 }
 0x500   :  { %1598 = vtanh.f32 %v1247_v63 }
 0x501   :  { %v1225_v34 = vpop.f32.mrf.mxu2  ;;  %v1238_v35 = vpop.f32.mrf.mxu3 }
 0x502   :  { %v1244_v39 = vadd.f32 %v1225_v34, %v236_v56  ;;  %v1245_v45 = vadd.f32 %v1238_v35, %v237_v62  ;;  %v1201_v46 = vpop.f32.mrf.mxu0  ;;  %v1214_v47 = vpop.f32.mrf.mxu1 }
 0x504   :  { %v1248_v51 = vmul.f32 0.5, %v1244_v39  ;;  %1600 = vtanh.f32 %v1245_v45 }
 0x505   :  { %v1597_v15 = vpop.eup %1596 }
 0x506   :  { %v1599_v21 = vpop.eup %1598  ;;  %v1252_v57 = vmul.f32 0.5, %v1597_v15  ;;  %1602 = vtanh.f32 %v1248_v51 }
 0x507   :  { %v1253_v14 = vmul.f32 0.5, %v1599_v21 }
 0x508   :  { %v1255_v20 = vadd.f32 0.5, %v1252_v57 }
 0x509   :  { %v1256_v59 = vadd.f32 0.5, %v1253_v14  ;;  %v1227_v60 = vpop.f32.mrf.mxu2  ;;  %v1240_v1 = vpop.f32.mrf.mxu3 }
 0x50a   :  { %v1601_v10 = vpop.eup %1600 }
 0x50b   :  { %v1259_v11 = vmul.f32 %v1256_v59, %v2211_v25  ;;  %v1260_v12 = vmul.f32 %v1601_v10, %v1255_v20 }
 0x50c   :  { %v1603_v19 = vpop.eup %1602 }
 0x50d   :  { %v1261_v27 = vadd.f32 %v1260_v12, %v1259_v11  ;;  %v1254_v28 = vmul.f32 0.5, %v1603_v19 }
 0x50f   :  { %1604 = vtanh.f32 %v1261_v27  ;;  %1290 = vst [vmem:[#allocation11] sm:$0xff] %v1261_v27  ;;  %v1257_v29 = vadd.f32 0.5, %v1254_v28 }
 0x515   :  { %v1605_v36 = vpop.eup %1604 }
 0x516   :  { %v1263_v44 = vmul.f32 %v1605_v36, %v1257_v29 }
 0x518   :  { %v1265_v48 = vrot.slane %v1263_v44, 1  ;;  %v1266_v49 = vrot.slane %v1263_v44, 2  ;;  %v1267_v50 = vrot.slane %v1263_v44, 3  ;;  %1279 = vst [vmem:[#allocation8 + $0x7] sm:$0x1] %v1263_v44  ;;  %v1268_v0 = vrot.slane %v1263_v44, 4 }
 0x519   :  { %1289 = vst [vmem:[#allocation9] sm:$0xff] %v1263_v44  ;;  %v1269_v23 = vrot.slane %v1263_v44, 5  ;;  %v1270_v53 = vrot.slane %v1263_v44, 6  ;;  %v1271_v2 = vrot.slane %v1263_v44, 7 }
 0x51a   :  { %1280 = vst [vmem:[#allocation8 + $0xf] sm:$0x1] %v1265_v48  ;;  %1314 = dma.vmem_to_hbm [thread:$0]  %s1310_s18, 128, %s1312_s21, [#allocation10]  }
 0x51b   :  { %1281 = vst [vmem:[#allocation8 + $0x17] sm:$0x1] %v1266_v49  ;;  %1325 = dma.vmem_to_hbm [thread:$0]  %s1321_s23, 128, %s1323_s25, [#allocation10]  }
 0x51c   :  { %1282 = vst [vmem:[#allocation8 + $0x1f] sm:$0x1] %v1267_v50 }
 0x51d   :  { %1283 = vst [vmem:[#allocation8 + $0x27] sm:$0x1] %v1268_v0 }
 0x51e   :  { %1284 = vst [vmem:[#allocation8 + $0x2f] sm:$0x1] %v1269_v23 }
 0x51f   :  { %1285 = vst [vmem:[#allocation8 + $0x37] sm:$0x1] %v1270_v53 }
 0x520   :  { %1286 = vst [vmem:[#allocation8 + $0x3f] sm:$0x1] %v1271_v2 }
 0x521   :  { %1303 = dma.vmem_to_hbm [thread:$0]  %s1296_s4, 1024, %s1298_s29, [#allocation7], %s1717_s5, %s1717_s5, %s1718_s30  }
 0x522   :  { %1704 = dma.done.wait [#allocation7], 1024  }
 0x523   :  { %1705 = vsyncadd [#allocation7], 4294966272 }
 0x524   :  { %1706 = dma.done.wait [#allocation10], 256  }
 0x525   :  { %1707 = vsyncadd [#allocation10], 4294967040 }
 0x526   :  { %1338 = vsyncpa [#allocation6], 1 }
 0x527   :  { %1339 = vsyncpa [#allocation7], 1 }
 0x528   :  { %1340 = vsyncpa [#allocation10], 1 }

</bundles_post_ra>
